<compile_context>
chip_gen: v7x
topology: tpu7x:2x2x1
jax: 0.10.0
libtpu: 0.0.40
codegen_flags: <defaults>
</compile_context>

<pallas_src>
import functools

import jax
import jax.numpy as jnp
from jax import lax
from jax.experimental import pallas as pl
from jax.experimental.pallas import tpu as pltpu


def _pick_row_tile(height, width):
    """Pick the output-row tile TH.

    Constraints: TH divides H, and TH*W (the lane-dense flat block width used
    for c / h_next / c_next) is a multiple of 128 unless TH == H (full block).
    Preference: more than one row tile per image (pipelining + bounded
    accumulator), M = TH*W in [128, 1024], M close to 512.
    """
    candidates = []
    for th in range(1, height + 1):
        if height % th:
            continue
        m = th * width
        if m % 128 != 0 and th != height:
            continue
        candidates.append(th)
    if not candidates:
        return height

    def score(th):
        m = th * width
        return (th < height, 128 <= m <= 1024, -abs(m - 512))

    return max(candidates, key=score)


# ---------------------------------------------------------------------------
# Fused ConvLSTM cell kernel: conv(cat[x,h]) + bias -> gates -> state update
# ---------------------------------------------------------------------------
def _convlstm_cell_kernel(comb_ref, c_ref, w_ref, b_ref, h_out_ref, c_out_ref,
                          *, kh, kw, ch, th):
    # comb_ref: (1, Hp, Wp, C)      bf16, full padded image for this batch elem
    # c_ref:    (1, ch, M)          f32, lane-dense flat c tile (M = th*W)
    # w_ref:    (kh*kw, C, 4*ch)    bf16 per-tap weights
    # b_ref:    (1, 4*ch)           f32 bias
    # outputs:  (1, ch, M)          f32 lane-dense flat h_next / c_next tiles
    _, hp, wp, C = comb_ref.shape
    W = wp - (kw - 1)
    M = th * W

    # Rows needed for this row tile (output rows [row0, row0+th) need padded
    # rows [row0, row0 + th + kh - 1)).  Dim 1 is an outer dim -> cheap slice.
    row0 = pl.multiple_of(pl.program_id(1) * th, th)
    rows = comb_ref[0, pl.ds(row0, th + kh - 1), :, :]        # (th+kh-1, Wp, C)

    # "Same"-padded conv as kh*kw shifted-window matmuls with K = cin+ch,
    # straight acc += dot chain (bf16 operands, f32 accumulation on the MXU).
    acc = jnp.zeros((M, 4 * ch), jnp.float32)
    for tap in range(kh * kw):
        ky, kx = divmod(tap, kw)
        win = rows[ky:ky + th, kx:kx + W, :].reshape(M, C)     # (M, C) bf16
        acc = acc + jnp.dot(win, w_ref[tap],
                            preferred_element_type=jnp.float32)
    acc = acc + b_ref[...]                                     # (1, 4*ch) bcast

    # One in-kernel transpose so the entire tail + stores are 128-lane dense
    # and the gate split is a clean sublane slice (PyTorch order: i, f, o, g).
    gates = acc.T                                              # (4*ch, M) f32
    sig = 1.0 / (1.0 + jnp.exp(-gates[0:3 * ch, :]))           # i|f|o together
    i = sig[0:ch, :]
    f = sig[ch:2 * ch, :]
    o = sig[2 * ch:3 * ch, :]
    g = jnp.tanh(gates[3 * ch:4 * ch, :])

    c_cur = c_ref[0]                                           # (ch, M) f32
    c_next = f * c_cur + i * g
    h_next = o * jnp.tanh(c_next)

    c_out_ref[0] = c_next.astype(c_out_ref.dtype)
    h_out_ref[0] = h_next.astype(h_out_ref.dtype)


# ---------------------------------------------------------------------------
# Wrapper: PyTorch-layout (NCHW / OIHW) in, (h_next, c_next) NCHW out
# ---------------------------------------------------------------------------
def convlstm_cell_forward(x, h_cur, c_cur, weight, bias,
                          *, kernel_size=(3, 3), row_tile=None):
    """ConvLSTMCell.forward.

    x:       (B, Cin, H, W)
    h_cur:   (B, Ch,  H, W)
    c_cur:   (B, Ch,  H, W)
    weight:  (4*Ch, Cin+Ch, kh, kw)   (PyTorch nn.Conv2d OIHW)
    bias:    (4*Ch,)
    returns  (h_next, c_next), each (B, Ch, H, W)
    """
    B, cin, H, W = x.shape
    ch = h_cur.shape[1]
    kh, kw = kernel_size
    ph, pw = kh // 2, kw // 2
    C = cin + ch
    assert weight.shape == (4 * ch, C, kh, kw)

    th = row_tile if row_tile is not None else _pick_row_tile(H, W)
    assert H % th == 0
    M = th * W
    assert (M % 128 == 0) or (th == H)

    # The only wrapper-side layout copy: cat([x, h]) (as in the module), moved
    # to NHWC + spatial halo padding + bf16 (MXU-native, halves HBM bytes).
    combined = jnp.concatenate([x, h_cur], axis=1).astype(jnp.bfloat16)
    comb_pad = jnp.pad(jnp.transpose(combined, (0, 2, 3, 1)),
                       ((0, 0), (ph, ph), (pw, pw), (0, 0)))
    hp_, wp_ = H + 2 * ph, W + 2 * pw

    # Weights per tap: (kh*kw, C, 4*ch) bf16; bias kept f32.
    w_taps = jnp.transpose(weight, (2, 3, 1, 0)).reshape(kh * kw, C, 4 * ch)
    w_taps = w_taps.astype(jnp.bfloat16)
    b2 = bias.reshape(1, 4 * ch).astype(jnp.float32)

    # c in lane-dense NCHW-flat layout: free reshape, no transpose, no extra
    # HBM pass.  Outputs use the same layout.
    c_flat = c_cur.reshape(B, ch, H * W).astype(jnp.float32)

    grid = (B, H // th)
    kernel = functools.partial(_convlstm_cell_kernel, kh=kh, kw=kw, ch=ch, th=th)

    h_flat, c_next_flat = pl.pallas_call(
        kernel,
        out_shape=(jax.ShapeDtypeStruct((B, ch, H * W), jnp.float32),
                   jax.ShapeDtypeStruct((B, ch, H * W), jnp.float32)),
        grid_spec=pltpu.PrefetchScalarGridSpec(
            num_scalar_prefetch=0,
            grid=grid,
            in_specs=[
                # Full padded image per batch element (re-DMA'd only when the
                # batch index changes); rows are sliced in-kernel (halo).
                pl.BlockSpec((1, hp_, wp_, C), lambda b, r: (b, 0, 0, 0)),
                # Lane-dense c tile.
                pl.BlockSpec((1, ch, M), lambda b, r: (b, 0, r)),
                # Resident weights / bias.
                pl.BlockSpec((kh * kw, C, 4 * ch), lambda b, r: (0, 0, 0)),
                pl.BlockSpec((1, 4 * ch), lambda b, r: (0, 0)),
            ],
            out_specs=(
                pl.BlockSpec((1, ch, M), lambda b, r: (b, 0, r)),
                pl.BlockSpec((1, ch, M), lambda b, r: (b, 0, r)),
            ),
        ),
        compiler_params=pltpu.CompilerParams(
            dimension_semantics=("parallel", "arbitrary"),
            vmem_limit_bytes=32 * 1024 * 1024,
        ),
    )(comb_pad, c_flat, w_taps, b2)

    # Free reshapes back to NCHW — no output transposes.
    h_next = h_flat.reshape(B, ch, H, W)
    c_next = c_next_flat.reshape(B, ch, H, W)
    return h_next, c_next


# ---------------------------------------------------------------------------
# Pure-JAX reference mirroring the PyTorch module line by line (NCHW, f32)
# ---------------------------------------------------------------------------
def _ref_convlstm_cell(x, h_cur, c_cur, weight, bias, kernel_size):
    kh, kw = kernel_size
    ph, pw = kh // 2, kw // 2
    combined = jnp.concatenate([x, h_cur], axis=1)
    cc = lax.conv_general_dilated(
        combined, weight, window_strides=(1, 1),
        padding=((ph, ph), (pw, pw)),
        dimension_numbers=("NCHW", "OIHW", "NCHW"))
    cc = cc + bias[None, :, None, None]
    cc_i, cc_f, cc_o, cc_g = jnp.split(cc, 4, axis=1)
    i = jax.nn.sigmoid(cc_i)
    f = jax.nn.sigmoid(cc_f)
    o = jax.nn.sigmoid(cc_o)
    g = jnp.tanh(cc_g)
    c_next = f * c_cur + i * g
    h_next = o * jnp.tanh(c_next)
    return h_next, c_next


# ---------------------------------------------------------------------------
if __name__ == "__main__":
    B, cin, ch, H, W = 2, 4, 32, 16, 16
    ks = (3, 3)

    key = jax.random.PRNGKey(0)
    k1, k2, k3, k4, k5 = jax.random.split(key, 5)
    x = jax.random.normal(k1, (B, cin, H, W), jnp.float32)
    h0 = jax.random.normal(k2, (B, ch, H, W), jnp.float32)
    c0 = jax.random.normal(k3, (B, ch, H, W), jnp.float32)
    fan_in = float((cin + ch) * ks[0] * ks[1])
    w = jax.random.normal(k4, (4 * ch, cin + ch, ks[0], ks[1]), jnp.float32)
    w = w * (1.0 / fan_in ** 0.5)
    b = 0.01 * jax.random.normal(k5, (4 * ch,), jnp.float32)

    fwd = jax.jit(functools.partial(convlstm_cell_forward, kernel_size=ks))
    h_next, c_next = fwd(x, h0, c0, w, b)
    h_next = jax.block_until_ready(h_next)
    c_next = jax.block_until_ready(c_next)

    assert h_next.shape == (B, ch, H, W), h_next.shape
    assert c_next.shape == (B, ch, H, W), c_next.shape

    h_ref_out, c_ref_out = _ref_convlstm_cell(x, h0, c0, w, b, ks)
    err_h = float(jnp.max(jnp.abs(h_next - h_ref_out)))
    err_c = float(jnp.max(jnp.abs(c_next - c_ref_out)))
    # bf16 MXU operands (f32 accumulation) give O(1e-2) worst-case abs error
    # on the bounded states; the elementwise tail is exact f32.
    if max(err_h, err_c) > 3e-2:
        raise AssertionError(
            f"mismatch vs reference: max|dh|={err_h}, max|dc|={err_c}")

    print("KERNEL_OK")
</pallas_src>

<mosaic_0001>
module attributes {stable_mosaic.version = 11 : i64} {
  func.func @_convlstm_cell_kernel(%arg0: i32, %arg1: i32, %arg2: memref<1x18x18x36xbf16, #tpu.memory_space<vmem>>, %arg3: memref<1x32x128xf32, #tpu.memory_space<vmem>>, %arg4: memref<9x36x128xbf16, #tpu.memory_space<vmem>>, %arg5: memref<1x128xf32, #tpu.memory_space<vmem>>, %arg6: memref<1x32x128xf32, #tpu.memory_space<vmem>>, %arg7: memref<1x32x128xf32, #tpu.memory_space<vmem>>) attributes {dimension_semantics = [#tpu.dimension_semantics<parallel>, #tpu.dimension_semantics<arbitrary>], iteration_bounds = array<i64: 2, 2>, scalar_prefetch = 0 : i64, scratch_operands = 0 : i64, tpu.core_type = #tpu.core_type<tc>, window_params = [{transform_indices = @transform_0, window_bounds = array<i64: 1, 18, 18, 36>}, {transform_indices = @transform_1, window_bounds = array<i64: 1, 32, 128>}, {pipeline_mode = #tpu.pipeline_mode<synchronous>, transform_indices = @transform_2, window_bounds = array<i64: 9, 36, 128>}, {pipeline_mode = #tpu.pipeline_mode<synchronous>, transform_indices = @transform_3, window_bounds = array<i64: 1, 128>}, {transform_indices = @transform_4, window_bounds = array<i64: 1, 32, 128>}, {transform_indices = @transform_5, window_bounds = array<i64: 1, 32, 128>}]} {
    %c8_i32 = arith.constant 8 : i32
    %0 = arith.muli %arg1, %c8_i32 : i32
    %1 = tpu.assume_multiple %0, 8 : i32
    %c0 = arith.constant 0 : index
    %2 = arith.index_cast %1 : i32 to index
    %c0_0 = arith.constant 0 : index
    %c0_1 = arith.constant 0 : index
    %3 = vector.load %arg2[%c0, %2, %c0_0, %c0_1] : memref<1x18x18x36xbf16, #tpu.memory_space<vmem>>, vector<1x10x18x36xbf16>
    %4 = vector.shape_cast %3 : vector<1x10x18x36xbf16> to vector<10x18x36xbf16>
    %cst = arith.constant 0.000000e+00 : f32
    %5 = vector.broadcast %cst : f32 to vector<128x128xf32>
    %6 = vector.extract_strided_slice %4 {offsets = [0, 0, 0], sizes = [8, 16, 36], strides = [1, 1, 1]} : vector<10x18x36xbf16> to vector<8x16x36xbf16>
    %7 = vector.shape_cast %6 : vector<8x16x36xbf16> to vector<128x36xbf16>
    %c0_2 = arith.constant 0 : index
    %c0_3 = arith.constant 0 : index
    %c0_4 = arith.constant 0 : index
    %8 = vector.load %arg4[%c0_2, %c0_3, %c0_4] : memref<9x36x128xbf16, #tpu.memory_space<vmem>>, vector<1x36x128xbf16>
    %9 = vector.shape_cast %8 : vector<1x36x128xbf16> to vector<36x128xbf16>
    %cst_5 = arith.constant dense<0.000000e+00> : vector<128x128xf32>
    %10 = tpu.matmul %7, %9, %cst_5 {dimension_numbers = #tpu.dot_dimension_numbers<[1], [0], [0], [1], [0, 0, 1, 1], [], []>} : vector<128x36xbf16>, vector<36x128xbf16>, vector<128x128xf32> -> vector<128x128xf32>
    %11 = arith.addf %5, %10 : vector<128x128xf32>
    %12 = vector.extract_strided_slice %4 {offsets = [0, 1, 0], sizes = [8, 16, 36], strides = [1, 1, 1]} : vector<10x18x36xbf16> to vector<8x16x36xbf16>
    %13 = vector.shape_cast %12 : vector<8x16x36xbf16> to vector<128x36xbf16>
    %c1 = arith.constant 1 : index
    %c0_6 = arith.constant 0 : index
    %c0_7 = arith.constant 0 : index
    %14 = vector.load %arg4[%c1, %c0_6, %c0_7] : memref<9x36x128xbf16, #tpu.memory_space<vmem>>, vector<1x36x128xbf16>
    %15 = vector.shape_cast %14 : vector<1x36x128xbf16> to vector<36x128xbf16>
    %cst_8 = arith.constant dense<0.000000e+00> : vector<128x128xf32>
    %16 = tpu.matmul %13, %15, %cst_8 {dimension_numbers = #tpu.dot_dimension_numbers<[1], [0], [0], [1], [0, 0, 1, 1], [], []>} : vector<128x36xbf16>, vector<36x128xbf16>, vector<128x128xf32> -> vector<128x128xf32>
    %17 = arith.addf %11, %16 : vector<128x128xf32>
    %18 = vector.extract_strided_slice %4 {offsets = [0, 2, 0], sizes = [8, 16, 36], strides = [1, 1, 1]} : vector<10x18x36xbf16> to vector<8x16x36xbf16>
    %19 = vector.shape_cast %18 : vector<8x16x36xbf16> to vector<128x36xbf16>
    %c2 = arith.constant 2 : index
    %c0_9 = arith.constant 0 : index
    %c0_10 = arith.constant 0 : index
    %20 = vector.load %arg4[%c2, %c0_9, %c0_10] : memref<9x36x128xbf16, #tpu.memory_space<vmem>>, vector<1x36x128xbf16>
    %21 = vector.shape_cast %20 : vector<1x36x128xbf16> to vector<36x128xbf16>
    %cst_11 = arith.constant dense<0.000000e+00> : vector<128x128xf32>
    %22 = tpu.matmul %19, %21, %cst_11 {dimension_numbers = #tpu.dot_dimension_numbers<[1], [0], [0], [1], [0, 0, 1, 1], [], []>} : vector<128x36xbf16>, vector<36x128xbf16>, vector<128x128xf32> -> vector<128x128xf32>
    %23 = arith.addf %17, %22 : vector<128x128xf32>
    %24 = vector.extract_strided_slice %4 {offsets = [1, 0, 0], sizes = [8, 16, 36], strides = [1, 1, 1]} : vector<10x18x36xbf16> to vector<8x16x36xbf16>
    %25 = vector.shape_cast %24 : vector<8x16x36xbf16> to vector<128x36xbf16>
    %c3 = arith.constant 3 : index
    %c0_12 = arith.constant 0 : index
    %c0_13 = arith.constant 0 : index
    %26 = vector.load %arg4[%c3, %c0_12, %c0_13] : memref<9x36x128xbf16, #tpu.memory_space<vmem>>, vector<1x36x128xbf16>
    %27 = vector.shape_cast %26 : vector<1x36x128xbf16> to vector<36x128xbf16>
    %cst_14 = arith.constant dense<0.000000e+00> : vector<128x128xf32>
    %28 = tpu.matmul %25, %27, %cst_14 {dimension_numbers = #tpu.dot_dimension_numbers<[1], [0], [0], [1], [0, 0, 1, 1], [], []>} : vector<128x36xbf16>, vector<36x128xbf16>, vector<128x128xf32> -> vector<128x128xf32>
    %29 = arith.addf %23, %28 : vector<128x128xf32>
    %30 = vector.extract_strided_slice %4 {offsets = [1, 1, 0], sizes = [8, 16, 36], strides = [1, 1, 1]} : vector<10x18x36xbf16> to vector<8x16x36xbf16>
    %31 = vector.shape_cast %30 : vector<8x16x36xbf16> to vector<128x36xbf16>
    %c4 = arith.constant 4 : index
    %c0_15 = arith.constant 0 : index
    %c0_16 = arith.constant 0 : index
    %32 = vector.load %arg4[%c4, %c0_15, %c0_16] : memref<9x36x128xbf16, #tpu.memory_space<vmem>>, vector<1x36x128xbf16>
    %33 = vector.shape_cast %32 : vector<1x36x128xbf16> to vector<36x128xbf16>
    %cst_17 = arith.constant dense<0.000000e+00> : vector<128x128xf32>
    %34 = tpu.matmul %31, %33, %cst_17 {dimension_numbers = #tpu.dot_dimension_numbers<[1], [0], [0], [1], [0, 0, 1, 1], [], []>} : vector<128x36xbf16>, vector<36x128xbf16>, vector<128x128xf32> -> vector<128x128xf32>
    %35 = arith.addf %29, %34 : vector<128x128xf32>
    %36 = vector.extract_strided_slice %4 {offsets = [1, 2, 0], sizes = [8, 16, 36], strides = [1, 1, 1]} : vector<10x18x36xbf16> to vector<8x16x36xbf16>
    %37 = vector.shape_cast %36 : vector<8x16x36xbf16> to vector<128x36xbf16>
    %c5 = arith.constant 5 : index
    %c0_18 = arith.constant 0 : index
    %c0_19 = arith.constant 0 : index
    %38 = vector.load %arg4[%c5, %c0_18, %c0_19] : memref<9x36x128xbf16, #tpu.memory_space<vmem>>, vector<1x36x128xbf16>
    %39 = vector.shape_cast %38 : vector<1x36x128xbf16> to vector<36x128xbf16>
    %cst_20 = arith.constant dense<0.000000e+00> : vector<128x128xf32>
    %40 = tpu.matmul %37, %39, %cst_20 {dimension_numbers = #tpu.dot_dimension_numbers<[1], [0], [0], [1], [0, 0, 1, 1], [], []>} : vector<128x36xbf16>, vector<36x128xbf16>, vector<128x128xf32> -> vector<128x128xf32>
    %41 = arith.addf %35, %40 : vector<128x128xf32>
    %42 = vector.extract_strided_slice %4 {offsets = [2, 0, 0], sizes = [8, 16, 36], strides = [1, 1, 1]} : vector<10x18x36xbf16> to vector<8x16x36xbf16>
    %43 = vector.shape_cast %42 : vector<8x16x36xbf16> to vector<128x36xbf16>
    %c6 = arith.constant 6 : index
    %c0_21 = arith.constant 0 : index
    %c0_22 = arith.constant 0 : index
    %44 = vector.load %arg4[%c6, %c0_21, %c0_22] : memref<9x36x128xbf16, #tpu.memory_space<vmem>>, vector<1x36x128xbf16>
    %45 = vector.shape_cast %44 : vector<1x36x128xbf16> to vector<36x128xbf16>
    %cst_23 = arith.constant dense<0.000000e+00> : vector<128x128xf32>
    %46 = tpu.matmul %43, %45, %cst_23 {dimension_numbers = #tpu.dot_dimension_numbers<[1], [0], [0], [1], [0, 0, 1, 1], [], []>} : vector<128x36xbf16>, vector<36x128xbf16>, vector<128x128xf32> -> vector<128x128xf32>
    %47 = arith.addf %41, %46 : vector<128x128xf32>
    %48 = vector.extract_strided_slice %4 {offsets = [2, 1, 0], sizes = [8, 16, 36], strides = [1, 1, 1]} : vector<10x18x36xbf16> to vector<8x16x36xbf16>
    %49 = vector.shape_cast %48 : vector<8x16x36xbf16> to vector<128x36xbf16>
    %c7 = arith.constant 7 : index
    %c0_24 = arith.constant 0 : index
    %c0_25 = arith.constant 0 : index
    %50 = vector.load %arg4[%c7, %c0_24, %c0_25] : memref<9x36x128xbf16, #tpu.memory_space<vmem>>, vector<1x36x128xbf16>
    %51 = vector.shape_cast %50 : vector<1x36x128xbf16> to vector<36x128xbf16>
    %cst_26 = arith.constant dense<0.000000e+00> : vector<128x128xf32>
    %52 = tpu.matmul %49, %51, %cst_26 {dimension_numbers = #tpu.dot_dimension_numbers<[1], [0], [0], [1], [0, 0, 1, 1], [], []>} : vector<128x36xbf16>, vector<36x128xbf16>, vector<128x128xf32> -> vector<128x128xf32>
    %53 = arith.addf %47, %52 : vector<128x128xf32>
    %54 = vector.extract_strided_slice %4 {offsets = [2, 2, 0], sizes = [8, 16, 36], strides = [1, 1, 1]} : vector<10x18x36xbf16> to vector<8x16x36xbf16>
    %55 = vector.shape_cast %54 : vector<8x16x36xbf16> to vector<128x36xbf16>
    %c8 = arith.constant 8 : index
    %c0_27 = arith.constant 0 : index
    %c0_28 = arith.constant 0 : index
    %56 = vector.load %arg4[%c8, %c0_27, %c0_28] : memref<9x36x128xbf16, #tpu.memory_space<vmem>>, vector<1x36x128xbf16>
    %57 = vector.shape_cast %56 : vector<1x36x128xbf16> to vector<36x128xbf16>
    %cst_29 = arith.constant dense<0.000000e+00> : vector<128x128xf32>
    %58 = tpu.matmul %55, %57, %cst_29 {dimension_numbers = #tpu.dot_dimension_numbers<[1], [0], [0], [1], [0, 0, 1, 1], [], []>} : vector<128x36xbf16>, vector<36x128xbf16>, vector<128x128xf32> -> vector<128x128xf32>
    %59 = arith.addf %53, %58 : vector<128x128xf32>
    %c0_30 = arith.constant 0 : index
    %c0_31 = arith.constant 0 : index
    %60 = vector.load %arg5[%c0_30, %c0_31] : memref<1x128xf32, #tpu.memory_space<vmem>>, vector<1x128xf32>
    %61 = vector.broadcast %60 : vector<1x128xf32> to vector<128x128xf32>
    %62 = arith.addf %59, %61 : vector<128x128xf32>
    %63 = tpu.transpose %62, [1, 0] : vector<128x128xf32> -> vector<128x128xf32>
    %64 = vector.extract_strided_slice %63 {offsets = [0, 0], sizes = [96, 128], strides = [1, 1]} : vector<128x128xf32> to vector<96x128xf32>
    %cst_32 = arith.constant 0.000000e+00 : f32
    %65 = vector.broadcast %cst_32 : f32 to vector<96x128xf32>
    %66 = arith.subf %65, %64 : vector<96x128xf32>
    %67 = math.exp %66 : vector<96x128xf32>
    %cst_33 = arith.constant 1.000000e+00 : f32
    %68 = vector.broadcast %cst_33 : f32 to vector<96x128xf32>
    %69 = arith.addf %68, %67 : vector<96x128xf32>
    %cst_34 = arith.constant 1.000000e+00 : f32
    %70 = vector.broadcast %cst_34 : f32 to vector<96x128xf32>
    %71 = arith.divf %70, %69 : vector<96x128xf32>
    %72 = vector.extract_strided_slice %71 {offsets = [0, 0], sizes = [32, 128], strides = [1, 1]} : vector<96x128xf32> to vector<32x128xf32>
    %73 = vector.extract_strided_slice %71 {offsets = [32, 0], sizes = [32, 128], strides = [1, 1]} : vector<96x128xf32> to vector<32x128xf32>
    %74 = vector.extract_strided_slice %71 {offsets = [64, 0], sizes = [32, 128], strides = [1, 1]} : vector<96x128xf32> to vector<32x128xf32>
    %75 = vector.extract_strided_slice %63 {offsets = [96, 0], sizes = [32, 128], strides = [1, 1]} : vector<128x128xf32> to vector<32x128xf32>
    %76 = math.tanh %75 : vector<32x128xf32>
    %c0_35 = arith.constant 0 : index
    %c0_36 = arith.constant 0 : index
    %c0_37 = arith.constant 0 : index
    %77 = vector.load %arg3[%c0_35, %c0_36, %c0_37] : memref<1x32x128xf32, #tpu.memory_space<vmem>>, vector<1x32x128xf32>
    %78 = vector.shape_cast %77 : vector<1x32x128xf32> to vector<32x128xf32>
    %79 = arith.mulf %73, %78 : vector<32x128xf32>
    %80 = arith.mulf %72, %76 : vector<32x128xf32>
    %81 = arith.addf %79, %80 : vector<32x128xf32>
    %82 = math.tanh %81 : vector<32x128xf32>
    %83 = arith.mulf %74, %82 : vector<32x128xf32>
    %c0_38 = arith.constant 0 : index
    %c0_39 = arith.constant 0 : index
    %c0_40 = arith.constant 0 : index
    %84 = vector.load %arg7[%c0_38, %c0_39, %c0_40] : memref<1x32x128xf32, #tpu.memory_space<vmem>>, vector<1x32x128xf32>
    %85 = vector.shape_cast %84 : vector<1x32x128xf32> to vector<32x128xf32>
    %86 = vector.shape_cast %81 : vector<32x128xf32> to vector<1x32x128xf32>
    tpu.vector_store %arg7[%c0_38, %c0_39, %c0_40], %86 {strides = array<i32>} : memref<1x32x128xf32, #tpu.memory_space<vmem>>, vector<1x32x128xf32>,
    %c0_41 = arith.constant 0 : index
    %c0_42 = arith.constant 0 : index
    %c0_43 = arith.constant 0 : index
    %87 = vector.load %arg6[%c0_41, %c0_42, %c0_43] : memref<1x32x128xf32, #tpu.memory_space<vmem>>, vector<1x32x128xf32>
    %88 = vector.shape_cast %87 : vector<1x32x128xf32> to vector<32x128xf32>
    %89 = vector.shape_cast %83 : vector<32x128xf32> to vector<1x32x128xf32>
    tpu.vector_store %arg6[%c0_41, %c0_42, %c0_43], %89 {strides = array<i32>} : memref<1x32x128xf32, #tpu.memory_space<vmem>>, vector<1x32x128xf32>,
    return
  }
  func.func @transform_0(%arg0: i32, %arg1: i32) -> (i32, i32, i32, i32) {
    %c0_i32 = arith.constant 0 : i32
    %c0_i32_0 = arith.constant 0 : i32
    %c0_i32_1 = arith.constant 0 : i32
    %c0_i32_2 = arith.constant 0 : i32
    return %arg0, %c0_i32, %c0_i32_0, %c0_i32_1 : i32, i32, i32, i32
  }
  func.func @transform_1(%arg0: i32, %arg1: i32) -> (i32, i32, i32) {
    %c0_i32 = arith.constant 0 : i32
    %c0_i32_0 = arith.constant 0 : i32
    return %arg0, %c0_i32, %arg1 : i32, i32, i32
  }
  func.func @transform_2(%arg0: i32, %arg1: i32) -> (i32, i32, i32) {
    %c0_i32 = arith.constant 0 : i32
    %c0_i32_0 = arith.constant 0 : i32
    %c0_i32_1 = arith.constant 0 : i32
    %c0_i32_2 = arith.constant 0 : i32
    return %c0_i32, %c0_i32_0, %c0_i32_1 : i32, i32, i32
  }
  func.func @transform_3(%arg0: i32, %arg1: i32) -> (i32, i32) {
    %c0_i32 = arith.constant 0 : i32
    %c0_i32_0 = arith.constant 0 : i32
    %c0_i32_1 = arith.constant 0 : i32
    return %c0_i32, %c0_i32_0 : i32, i32
  }
  func.func @transform_4(%arg0: i32, %arg1: i32) -> (i32, i32, i32) {
    %c0_i32 = arith.constant 0 : i32
    %c0_i32_0 = arith.constant 0 : i32
    return %arg0, %c0_i32, %arg1 : i32, i32, i32
  }
  func.func @transform_5(%arg0: i32, %arg1: i32) -> (i32, i32, i32) {
    %c0_i32 = arith.constant 0 : i32
    %c0_i32_0 = arith.constant 0 : i32
    return %arg0, %c0_i32, %arg1 : i32, i32, i32
  }
}

</mosaic_0001>

<bundles_post_ra>
// kernel: convlstm_cell_forward.1
= control target key start
LH: loop header
LB: loop body
LE: loop exit
PB: predicated region body
PF: predicated region fallthrough
CT: control target
= control target key end

     0   :  { %s3353_s18 = smov 0   ;;  %s3355_s19 = smov 0   ;;  %s4126_s0 = inlined_call_operand.vmem [shape: bf16[2,18,18,36], index: 0, kind: input, shape index: {}]   ;;  %s4127_s1 = inlined_call_operand.vmem [shape: f32[2,32,256], index: 1, kind: input, shape index: {}]   ;;  %s4128_s2 = inlined_call_operand.vmem [shape: bf16[9,36,128], index: 2, kind: input, shape index: {}]   ;;  %s4129_s3 = inlined_call_operand.vmem [shape: f32[1,128], index: 3, kind: input, shape index: {}]   ;;  %s4130_s4 = inlined_call_operand.vmem [shape: f32[2,32,256], index: 4, kind: output, shape index: {0}]   ;;  %s4131_s5 = inlined_call_operand.vmem [shape: f32[2,32,256], index: 5, kind: output, shape index: {1}]  }
   0x1   :  { %s3357_s20 = smov 0   ;;  %s3359_s21 = smov 0  }
   0x2   :  { %s3361_s22 = smov 0   ;;  %s3363_s23 = smov 0  }
   0x3   :  { %s3365_s24 = smov 0  }
   0x4 LB: > { %s25_s25 = sadd.s32 1, %s3313_s22  ;;  %s28_s26 = sadd.s32 1, %s3317_s23  ;;  %s3321_s24 = sphi %s3365_s24, %s16_s24   ;;  %s3317_s23 = sphi %s3363_s23, %s4142_s23   ;;  %s3313_s22 = sphi %s3361_s22, %s4141_s22   ;;  %s3309_s21 = sphi %s3359_s21, %s4140_s21   ;;  %s3305_s20 = sphi %s3357_s20, %s4139_s20   ;;  %s3301_s19 = sphi %s3355_s19, %s4138_s19   ;;  %s3297_s18 = sphi %s3353_s18, %s4137_s18  }
   0x5   : > { %p26_p0 = scmp.ge.s32.totalorder %s25_s25, 2  ;;  %s2464_s27 = sadd.s32 4294967295, %s3321_s24  }
   0x6   : > { %p70_p1 = scmp.ne.s32.totalorder %s3301_s19, %s3297_s18  ;;  %p71_p2 = scmp.eq.s32.totalorder %s3321_s24, 0 }
   0x7   : > { %s4144_s25 = smov (%p26_p0, %s25_s25), 0  ;;  %s4146_s26 = smov (!%p26_p0, %s28_s26), %s3317_s23 }
   0x8   : > { %p30_p3 = scmp.ge.s32.totalorder %s4146_s26, 2  ;;  %p144_p4 = scmp.eq.s32.totalorder %s2464_s27, 3 }
   0x9   : > { %s59_s28 = ssub.s32 %s3313_s22, %s4144_s25  ;;  %p72_p5 = por %p71_p2, %p70_p1 }
   0xa   : > { %s4148_s26 = smov (%p30_p3, %s4146_s26), 0  ;;  %p3401_p6 = por %p144_p4, %p70_p1 }
   0xb   : > { %s58_s30 = ssub.s32 %s3317_s23, %s4148_s26  ;;  %s63_s7 = sadd.s32 1, %s3301_s19 }
   0xc   : > { %s60_s6 = sor.u32 %s59_s28, %s58_s30  ;;  %p2467_p8 = scmp.ge.s32.totalorder %s3321_s24, 4 }
   0xd   : > { %p61_p7 = scmp.eq.s32.totalorder %s60_s6, 0 }
   0xe   : > { %200 = sbr.rel (%p2467_p8) target bundleno = 29 (0x1d), region = 24 }
   0xf   : > { %s3409_s8 = scalar_select %p61_p7, %s3301_s19, %s63_s7  }
  0x15   : > { %211 = sbr.rel (!%p72_p5) target bundleno = 29 (0x1d), region = 32  ;;  %s213_s9 = sand.u32 (%p72_p5), 1, %s3301_s19  }
  0x16   : > { %s2469_s10 = sshll.u32 (%p72_p5), %s3317_s23, 3  ;;  %s2468_s11 = sshll.u32 (%p72_p5), %s213_s9, 5 }
  0x17   : > { %s217_s12 = sadd.s32 (%p72_p5), %s3313_s22, %s2469_s10  ;;  %s215_s17 = scalar_lea.vmem (%p72_p5), [#allocation2], %s2468_s11 }
  0x18   : > { %s2470_s13 = sshll.u32 (%p72_p5), %s217_s12, 3 }
  0x19   : > { %s219_s16 = scalar_lea.vmem (%p72_p5), %s4127_s1, %s2470_s13 }
  0x1a   : > { %v253_v0 = vld [vmem:[%s219_s16] sm:$0xff] (%p72_p5)  ;;  %v255_v1 = vld [vmem:[%s219_s16 + $0x10] sm:$0xff] (%p72_p5) }
  0x1b   : > { %v257_v2 = vld [vmem:[%s219_s16 + $0x20] sm:$0xff] (%p72_p5)  ;;  %254 = vst [vmem:[%s215_s17] sm:$0xff] (%p72_p5), %v253_v0  ;;  %256 = vst [vmem:[%s215_s17 + $0x8] sm:$0xff] (%p72_p5), %v255_v1  ;;  %v259_v3 = vld [vmem:[%s219_s16 + $0x30] sm:$0xff] (%p72_p5) }
  0x1c   : > { %258 = vst [vmem:[%s215_s17 + $0x10] sm:$0xff] %v257_v2  ;;  %260 = vst [vmem:[%s215_s17 + $0x18] sm:$0xff] %v259_v3 }
  0x1d PF: > { %p2471_p9 = scmp.ge.s32.totalorder %s3321_s24, 1  ;;  %p265_p10 = scmp.lt.s32.totalorder %s3321_s24, 5 }
  0x1f   : > { %p266_p11 = pnand %p2471_p9, %p265_p10 }
  0x20   : > { %v3423_v4 = vld [vmem:[%s4128_s2 + $0x50] sm:$0xff] (!%p266_p11)   ;;  %p307_p12 = scmp.lt.s32.totalorder (!%p266_p11), %s3309_s21, 1  ;;  %v3433_v6 = vld [vmem:[%s4128_s2 + $0x58] sm:$0xff] (!%p266_p11)   ;;  %vm617_vm0 = vcmask (!%p266_p11), 1041408   ;;  %s2667_s15 = smul.u32 (!%p266_p11), 96, %s3305_s20  ;;  %v3466_v12 = vld [vmem:[%s4128_s2 + $0x64] sm:$0xff] (!%p266_p11)  }
  0x21   : > { %269 = sbr.rel (%p266_p11) target bundleno = 631 (0x277), region = 70  ;;  %v3167_v5 = vld [vmem:[%s4128_s2 + $0x14] sm:$0xff] (!%p266_p11)   ;;  %2855 = vmatprep.subr.bf16.mxu0 (!%p266_p11), %v3423_v4  ;;  %v3169_v7 = vld [vmem:[%s4128_s2 + $0x1c] sm:$0xff] (!%p266_p11)   ;;  %v3171_v9 = vld [vmem:[%s4128_s2 + $0x24] ss:$0 sps:$4 sm:$0x33] (!%p266_p11)  }
  0x22   : > { %2767 = vmatprep.subr.bf16.mxu1 (!%p266_p11), %v3167_v5  ;;  %2856 = vmatpush3.bf16.msra.mxu0 (!%p266_p11), %v3423_v4  ;;  %v3444_v8 = vld [vmem:[%s4128_s2 + $0x60] ss:$0 sps:$4 sm:$0x33] (!%p266_p11)   ;;  %vm352_vm1 = vsmask.f32 (!%p266_p11), 3328  ;;  %v619_v11 = vsel (!%p266_p11), %vm617_vm0, %v3171_v9, 0 }
  0x23   : > { %2768 = vmatpush3.bf16.msra.mxu1 (!%p266_p11), %v3167_v5  ;;  %2857 = vmatprep.subr.bf16.mxu0 (!%p266_p11), %v3433_v6  ;;  %v3452_v10 = vsel (!%p266_p11), %vm617_vm0, %v3444_v8, 0  ;;  %vm353_vm2 = vsmask.f32 (!%p266_p11), 7440  ;;  %vm592_vm3 = vcmask (!%p266_p11), 293888   ;;  %v3176_v42 = vld [vmem:[%s4128_s2] sm:$0xff] (!%p266_p11)   ;;  %vm905_vm5 = vcmask (!%p266_p11), 1042432  }
  0x24   : > { %2769 = vmatprep.subr.bf16.mxu1 (!%p266_p11), %v3169_v7  ;;  %vm3504_vm4 = vmor (!%p266_p11), %vm352_vm1, %vm353_vm2  ;;  %vm906_vm6 = vcmask (!%p266_p11), 1046532  }
  0x25   : > { %vm3588_vm7 = vmor (!%p266_p11), %vm905_vm5, %vm906_vm6 }
  0x26   : > { %2858 = vmatpush3.bf16.msra.mxu0 (!%p266_p11), %v3433_v6 }
  0x27   : > { %2770 = vmatpush3.bf16.msra.mxu1 (!%p266_p11), %v3169_v7  ;;  %3103 = vmatprep.subr.msk.bf16.mxu0 (!%p266_p11), %vm617_vm0, %v3444_v8 }
  0x28   : > { %s308_s12 = scalar_select %p307_p12, %s3309_s21, 1  ;;  %3099 = vmatprep.subr.msk.bf16.mxu1 %vm617_vm0, %v3171_v9 }
  0x29   : > { %s2661_s16 = sshll.u32 (%p3401_p6), %s3309_s21, 3 }
  0x2a   : > { %s3109_s27 = smul.u32 216, %s308_s12  ;;  %2860 = vmatpush3.bf16.msra.mxu0 %v3452_v10  ;;  %s272_s12 = sand.u32 1, %s3297_s18  }
  0x2b   : > { %2772 = vmatpush3.bf16.msra.mxu1 %v619_v11  ;;  %2877 = vmatprep.subr.bf16.mxu0 %v3466_v12  ;;  %s4070_s13 = sshll.u32 %s272_s12, 5  ;;  %s2250_s17 = sadd.s32 (%p3401_p6), %s3305_s20, %s2661_s16 }
  0x2c   : > { %s311_s6 = scalar_lea.vmem %s4126_s0, %s3109_s27  ;;  %2789 = vmatprep.subr.bf16.mxu1 %v3176_v42  ;;  %s4073_s18 = scalar_lea.vmem [#allocation2], %s4070_s13 }
  0x2d   : > { %s3461_s7 = scalar_lea.vmem %s311_s6, %s2667_s15  ;;  %s4079_s14 = scalar_lea.vmem [#allocation4], %s4070_s13 }
  0x2e   : > { %v3470_v13 = vld [vmem:[%s3461_s7] sm:$0xf]  ;;  %v3473_v14 = vld [vmem:[%s3461_s7 + $0x4] sm:$0xf]  ;;  %v3476_v15 = vld [vmem:[%s3461_s7 + $0x8] sm:$0x1] }
  0x2f   : > { %v356_v16 = vshrl.u32 %v3470_v13, 16  ;;  %v359_v17 = vshll.u32 %v3470_v13, 16  ;;  %v365_v18 = vshll.u32 %v3473_v14, 16  ;;  %v369_v19 = vshrl.u32 %v3473_v14, 16  ;;  %v3483_v20 = vld [vmem:[%s3461_s7 + $0xc] sm:$0xf] }
  0x30   : > { %v375_v21 = vshll.u32 %v3476_v15, 16  ;;  %v3488_v22 = vld [vmem:[%s3461_s7 + $0x10] sm:$0xf]  ;;  %v3491_v23 = vld [vmem:[%s3461_s7 + $0x14] sm:$0x1]  ;;  %v380_v29 = vshrl.u32 %v3483_v20, 16 }
  0x31   : > { %v358_v24 = vrot.slane %v356_v16, 4  ;;  %v361_v25 = vrot.slane %v359_v17, 5  ;;  %v367_v26 = vrot.slane %v365_v18, 5  ;;  %v371_v27 = vrot.slane %v369_v19, 4  ;;  %v3500_v36 = vld [vmem:[%s3461_s7 + $0x18] sm:$0xf] }
  0x32   : > { %v377_v28 = vrot.slane %v375_v21, 5  ;;  %v383_v30 = vshll.u32 %v3483_v20, 16  ;;  %v389_v31 = vshll.u32 %v3488_v22, 16  ;;  %v393_v34 = vshrl.u32 %v3488_v22, 16  ;;  %v3509_v41 = vld [vmem:[%s3461_s7 + $0x1c] sm:$0xf] }
  0x33   : > { %v362_v32 = vor.u32 %v361_v25, %v358_v24  ;;  %v372_v33 = vor.u32 %v371_v27, %v367_v26  ;;  %v399_v35 = vshll.u32 %v3491_v23, 16  ;;  %v382_v38 = vrot.slane %v380_v29, 4  ;;  %v3516_v49 = vld [vmem:[%s3461_s7 + $0x20] sm:$0x1]  ;;  %v3526_v56 = vld [vmem:[%s3461_s7 + $0x24] sm:$0xf] }
  0x34   : > { %v385_v39 = vrot.slane %v383_v30, 5  ;;  %v391_v40 = vrot.slane %v389_v31, 5  ;;  %v395_v45 = vrot.slane %v393_v34, 4  ;;  %v920_v48 = vrot.slane %v3491_v23, 5  ;;  %v3529_v57 = vld [vmem:[%s3461_s7 + $0x28] sm:$0xf] }
  0x35   : > { %v363_v43 = vrot.slane %v362_v32, 4  ;;  %v373_v44 = vrot.slane %v372_v33, 4  ;;  %v401_v46 = vrot.slane %v399_v35, 5  ;;  %v404_v50 = vshrl.u32 %v3500_v36, 16  ;;  %v3539_v9 = vld [vmem:[%s3461_s7 + $0x2c] sm:$0x1] }
  0x36   : > { %v386_v47 = vor.u32 %v385_v39, %v382_v38  ;;  %v407_v51 = vshll.u32 %v3500_v36, 16  ;;  %v396_v54 = vor.u32 %v395_v45, %v391_v40  ;;  %v413_v55 = vshll.u32 %v3509_v41, 16  ;;  %v3542_v11 = vld [vmem:[%s3461_s7 + $0x30] sm:$0xf]  ;;  %v3548_v21 = vld [vmem:[%s3461_s7 + $0x34] sm:$0xf] }
  0x37   : > { %v368_v52 = vsel %vm3504_vm4, %v363_v43, %v367_v26  ;;  %v378_v53 = vsel %vm3504_vm4, %v373_v44, %v377_v28  ;;  %v406_v60 = vrot.slane %v404_v50, 4  ;;  %v417_v0 = vshrl.u32 %v3509_v41, 16  ;;  %v3553_v28 = vld [vmem:[%s3461_s7 + $0x38] sm:$0x1]  ;;  %v3178_v29 = vld [vmem:[%s4128_s2 + $0x8] sm:$0xff]   ;;  %s300_s15 = scalar_lea.vmem [#allocation3], %s4070_s13 }
  0x38   : > { %v2484_v58 = vcombine.low %v368_v52, %v378_v53  ;;  %v387_v59 = vrot.slane %v386_v47, 4  ;;  %v409_v61 = vrot.slane %v407_v51, 5  ;;  %v397_v62 = vrot.slane %v396_v54, 4  ;;  %v3177_v23 = vld [vmem:[%s4128_s2 + $0x78] sm:$0xff]   ;;  %s2662_s27 = sshll.u32 (%p3401_p6), %s2250_s17, 3 }
  0x39   : > { %v415_v63 = vrot.slane %v413_v55, 5  ;;  %v423_v1 = vshll.u32 %v3516_v49, 16  ;;  %v924_v5 = vrot.slane %v3509_v41, 5  ;;  %v927_v7 = vrot.slane %v3516_v49, 5  ;;  %v3684_v49 = vld [vmem:[%s3461_s7 + $0x58] sm:$0xf]  ;;  %s2252_s6 = scalar_lea.vmem (%p3401_p6), %s4130_s4, %s2662_s27 }
  0x3a   : > { %2773 = vmatprep.mubr.msk.bf16.mxu1 %vm592_vm3, %v2484_v58  ;;  %v392_v2 = vsel %vm3504_vm4, %v387_v59, %v391_v40  ;;  %v410_v3 = vor.u32 %v409_v61, %v406_v60  ;;  %v402_v16 = vsel %vm3504_vm4, %v397_v62, %v401_v46  ;;  %v419_v17 = vrot.slane %v417_v0, 4  ;;  %v3568_v40 = vld [vmem:[%s4128_s2 + $0x74] ss:$0 sps:$4 sm:$0x33]  }
  0x3b   : > { %v425_v18 = vrot.slane %v423_v1, 5  ;;  %v428_v19 = vshrl.u32 %v3526_v56, 16  ;;  %v2485_v24 = vcombine.low %v392_v2, %v402_v16  ;;  %v431_v26 = vshll.u32 %v3526_v56, 16 }
  0x3c   : > { %v411_v25 = vrot.slane %v410_v3, 4  ;;  %v437_v27 = vshll.u32 %v3529_v57, 16  ;;  %v420_v30 = vor.u32 %v419_v17, %v415_v63  ;;  %v441_v32 = vshrl.u32 %v3529_v57, 16 }
  0x3d   : > { %v430_v31 = vrot.slane %v428_v19, 4  ;;  %v447_v33 = vshll.u32 %v3539_v9, 16  ;;  %2861 = vmatprep.mubr.msk.bf16.mxu0 %vm592_vm3, %v2485_v24  ;;  %2774 = vmatmul.mubr.msk.bf16.vlgmr.msra.gmra.mrb[0].mxu1 %vm592_vm3, %v2485_v24  ;;  %v433_v35 = vrot.slane %v431_v26, 5  ;;  %v452_v39 = vshrl.u32 %v3542_v11, 16  ;;  %v3604_v26 = vld [vmem:[%s3461_s7 + $0x44] sm:$0x1] }
  0x3e   : > { %v416_v34 = vsel %vm3504_vm4, %v411_v25, %v415_v63  ;;  %v439_v38 = vrot.slane %v437_v27, 5  ;;  %v421_v43 = vrot.slane %v420_v30, 4  ;;  %v443_v44 = vrot.slane %v441_v32, 4  ;;  %2790 = vmatpush3.bf16.msra.mxu1 %v3176_v42  ;;  %v3174_v42 = vld [vmem:[%s4128_s2 + $0x6c] sm:$0xff]   ;;  %v3582_v63 = vld [vmem:[%s3461_s7 + $0x3c] sm:$0xf] }
  0x3f   : > { %v449_v45 = vrot.slane %v447_v33, 5  ;;  %v455_v46 = vshll.u32 %v3542_v11, 16  ;;  %v434_v47 = vor.u32 %v433_v35, %v430_v31  ;;  %v454_v50 = vrot.slane %v452_v39, 4  ;;  %2791 = vmatprep.subr.bf16.mxu1 %v3178_v29  ;;  %v3601_v25 = vld [vmem:[%s3461_s7 + $0x40] sm:$0xf] }
  0x40   : > { %v461_v51 = vshll.u32 %v3548_v21, 16  ;;  %v465_v52 = vshrl.u32 %v3548_v21, 16  ;;  %v426_v53 = vsel %vm3504_vm4, %v421_v43, %v425_v18  ;;  %v444_v54 = vor.u32 %v443_v44, %v439_v38  ;;  %v3619_v39 = vld [vmem:[%s3461_s7 + $0x4c] sm:$0xf] }
  0x41   : > { %v457_v55 = vrot.slane %v455_v46, 5  ;;  %v471_v58 = vshll.u32 %v3553_v28, 16  ;;  %v3576_v59 = vcombine.low %v416_v34, %v426_v53  ;;  %v435_v60 = vrot.slane %v434_v47, 4 }
  0x42   : > { %v463_v61 = vrot.slane %v461_v51, 5  ;;  %v467_v62 = vrot.slane %v465_v52, 4  ;;  %v445_v0 = vrot.slane %v444_v54, 4  ;;  %v1497_v3 = vsel %vm617_vm0, %v3568_v40, 0  ;;  %2792 = vmatpush3.bf16.msra.mxu1 %v3178_v29 }
  0x43   : > { %v458_v1 = vor.u32 %v457_v55, %v454_v50  ;;  %v473_v2 = vrot.slane %v471_v58, 5  ;;  %2862 = vmatmul.mubr.msk.bf16.vlgmr.msra.gmra.mrb[0].mxu0 %vm592_vm3, %v3576_v59  ;;  %2777 = vmatprep.mubr.msk.bf16.mxu1 %vm592_vm3, %v3576_v59  ;;  %v440_v17 = vsel %vm3504_vm4, %v435_v60, %v439_v38  ;;  %v2523_v19 = vrot.slane %v3483_v20, 9  ;;  %v3616_v38 = vld [vmem:[%s3461_s7 + $0x48] sm:$0xf] }
  0x44   : > { %v468_v18 = vor.u32 %v467_v62, %v463_v61  ;;  %v917_v24 = vrot.slane %v3488_v22, 5  ;;  %2878 = vmatpush3.bf16.msra.mxu0 %v3466_v12  ;;  %v450_v27 = vsel %vm3504_vm4, %v445_v0, %v449_v45  ;;  %v476_v30 = vshrl.u32 %v3582_v63, 16  ;;  %v3643_v58 = vld [vmem:[%s4128_s2 + $0x10] ss:$0 sps:$4 sm:$0x33]  }
  0x45   : > { %v459_v29 = vrot.slane %v458_v1, 4  ;;  %v479_v31 = vshll.u32 %v3582_v63, 16  ;;  %2879 = vmatprep.subr.bf16.mxu0 %v3174_v42  ;;  %v3611_v32 = vcombine.low %v440_v17, %v450_v27  ;;  %v485_v45 = vshll.u32 %v3601_v25, 16  ;;  %v3656_v0 = vld [vmem:[%s3461_s7 + $0x50] sm:$0x1]  ;;  %3100 = vmatprep.subr.msk.bf16.mxu1 %vm617_vm0, %v3643_v58 }
  0x46   : > { %v469_v33 = vrot.slane %v468_v18, 4  ;;  %v918_v34 = vsel %vm3588_vm7, %v2523_v19, %v917_v24  ;;  %v919_v35 = vrot.slane %v917_v24, 4  ;;  %v478_v43 = vrot.slane %v476_v30, 4  ;;  %v3675_v27 = vld [vmem:[%s3461_s7 + $0x54] sm:$0xf] }
  0x47   : > { %v464_v12 = vsel %vm3504_vm4, %v459_v29, %v463_v61  ;;  %v481_v44 = vrot.slane %v479_v31, 5  ;;  %2865 = vmatprep.mubr.msk.bf16.mxu0 %vm592_vm3, %v3611_v32  ;;  %2778 = vmatmul.mubr.msk.bf16.gmra.mrb[4].mxu1 %vm592_vm3, %v3611_v32  ;;  %v489_v50 = vshrl.u32 %v3601_v25, 16  ;;  %v495_v51 = vshll.u32 %v3604_v26, 16 }
  0x48   : > { %v474_v46 = vsel %vm3504_vm4, %v469_v33, %v473_v2  ;;  %v921_v47 = vsel %vm3588_vm7, %v919_v35, %v920_v48  ;;  %2880 = vmatpush3.bf16.msra.mxu0 %v3174_v42  ;;  %v487_v55 = vrot.slane %v485_v45, 5  ;;  %v2524_v60 = vrot.slane %v3500_v36, 9 }
  0x49   : > { %v3636_v52 = vcombine.low %v464_v12, %v474_v46  ;;  %v3638_v53 = vcombine.low %v918_v34, %v921_v47  ;;  %v482_v54 = vor.u32 %v481_v44, %v478_v43  ;;  %3105 = vmatprep.subr.msk.bf16.mxu0 %vm617_vm0, %v3568_v40  ;;  %v491_v48 = vrot.slane %v489_v50, 4  ;;  %v3688_v12 = vld [vmem:[%s3461_s7 + $0x5c] sm:$0x1] }
  0x4a   : > { %v497_v42 = vrot.slane %v495_v51, 5  ;;  %v926_v61 = vrot.slane %v924_v5, 4  ;;  %v500_v40 = vshrl.u32 %v3616_v38, 16  ;;  %v503_v1 = vshll.u32 %v3616_v38, 16 }
  0x4b   : > { %2781 = vmatprep.mubr.msk.bf16.mxu1 %vm592_vm3, %v3636_v52  ;;  %v483_v62 = vrot.slane %v482_v54, 4  ;;  %v509_v2 = vshll.u32 %v3619_v39, 16  ;;  %2866 = vmatmul.mubr.msk.bf16.gmra.mrb[4].mxu0 %vm592_vm3, %v3636_v52  ;;  %v492_v17 = vor.u32 %v491_v48, %v487_v55  ;;  %v925_v18 = vsel %vm3588_vm7, %v2524_v60, %v924_v5  ;;  %v3179_v54 = vld [vmem:[%s4128_s2 + $0x80] sm:$0xff]  }
  0x4c   : > { %v928_v19 = vsel %vm3588_vm7, %v926_v61, %v927_v7  ;;  %v513_v24 = vshrl.u32 %v3619_v39, 16  ;;  %2882 = vmatpush3.bf16.msra.mxu0 %v1497_v3  ;;  %2883 = vmatprep.mubr.msk.bf16.mxu0 %vm592_vm3, %v3638_v53  ;;  %v502_v5 = vrot.slane %v500_v40, 4  ;;  %v505_v31 = vrot.slane %v503_v1, 5 }
  0x4d   : > { %v488_v29 = vsel %vm3504_vm4, %v483_v62, %v487_v55  ;;  %v3681_v30 = vcombine.low %v925_v18, %v928_v19  ;;  %2899 = vmatprep.subr.bf16.mxu0 %v3177_v23  ;;  %v493_v33 = vrot.slane %v492_v17, 4  ;;  %v511_v7 = vrot.slane %v509_v2, 5 }
  0x4e   : > { %v515_v34 = vrot.slane %v513_v24, 4  ;;  %v519_v35 = vshll.u32 %v3656_v0, 16  ;;  %v506_v3 = vor.u32 %v505_v31, %v502_v5  ;;  %v2525_v43 = vrot.slane %v3526_v56, 9  ;;  %v3722_v31 = vld [vmem:[%s4128_s2 + $0x28] sm:$0xff]  }
  0x4f   : > { %v931_v44 = vrot.slane %v3529_v57, 5  ;;  %v934_v45 = vrot.slane %v3539_v9, 5  ;;  %v498_v46 = vsel %vm3504_vm4, %v493_v33, %v497_v42  ;;  %v524_v51 = vshrl.u32 %v3675_v27, 16 }
  0x50   : > { %v516_v47 = vor.u32 %v515_v34, %v511_v7  ;;  %v521_v50 = vrot.slane %v519_v35, 5  ;;  %v3699_v55 = vcombine.low %v488_v29, %v498_v46  ;;  %v507_v48 = vrot.slane %v506_v3, 4 }
  0x51   : > { %v932_v60 = vsel %vm3588_vm7, %v2525_v43, %v931_v44  ;;  %v933_v61 = vrot.slane %v931_v44, 4  ;;  %v526_v9 = vrot.slane %v524_v51, 4  ;;  %v527_v40 = vshll.u32 %v3675_v27, 16 }
  0x52   : > { %v517_v62 = vrot.slane %v516_v47, 4  ;;  %v533_v42 = vshll.u32 %v3684_v49, 16  ;;  %2782 = vmatmul.mubr.msk.bf16.gmra.mrb[8].mxu1 %vm592_vm3, %v3699_v55  ;;  %v512_v1 = vsel %vm3504_vm4, %v507_v48, %v511_v7  ;;  %v537_v17 = vshrl.u32 %v3684_v49, 16 }
  0x53   : > { %v935_v2 = vsel %vm3588_vm7, %v933_v61, %v934_v45  ;;  %v543_v18 = vshll.u32 %v3688_v12, 16  ;;  %2884 = vmatmul.mubr.msk.bf16.vlgmr.msra.gmra.mrb[0].mxu0 %vm592_vm3, %v3681_v30  ;;  %v529_v29 = vrot.slane %v527_v40, 5  ;;  %v2526_v35 = vrot.slane %v3542_v11, 9  ;;  %v3748_v40 = vld [vmem:[%s3461_s7 + $0x64] sm:$0xf] }
  0x54   : > { %v522_v19 = vsel %vm3504_vm4, %v517_v62, %v521_v50  ;;  %v3717_v24 = vcombine.low %v932_v60, %v935_v2  ;;  %v535_v5 = vrot.slane %v533_v42, 5  ;;  %2900 = vmatpush3.bf16.msra.mxu0 %v3177_v23  ;;  %v539_v7 = vrot.slane %v537_v17, 4  ;;  %v3182_v23 = vld [vmem:[%s4128_s2 + $0x88] ss:$0 sps:$4 sm:$0x33]  }
  0x55   : > { %v3724_v33 = vcombine.low %v512_v1, %v522_v19  ;;  %v545_v34 = vrot.slane %v543_v18, 5  ;;  %v530_v3 = vor.u32 %v529_v29, %v526_v9  ;;  %v938_v43 = vrot.slane %v3548_v21, 5  ;;  %2901 = vmatprep.subr.bf16.mxu0 %v3179_v54 }
  0x56   : > { %2887 = vmatprep.mubr.msk.bf16.mxu0 %vm592_vm3, %v3717_v24  ;;  %v941_v44 = vrot.slane %v3553_v28, 5  ;;  %v798_v45 = vsel %vm617_vm0, %v3643_v58, 0  ;;  %v540_v46 = vor.u32 %v539_v7, %v535_v5  ;;  %v2527_v47 = vrot.slane %v3582_v63, 9 }
  0x57   : > { %2785 = vmatprep.mubr.msk.bf16.mxu1 %vm592_vm3, %v3724_v33  ;;  %2794 = vmatpush3.bf16.msra.mxu1 %v798_v45  ;;  %v945_v50 = vrot.slane %v3601_v25, 5  ;;  %v948_v28 = vrot.slane %v3604_v26, 5  ;;  %v531_v51 = vrot.slane %v530_v3, 4  ;;  %v939_v58 = vsel %vm3588_vm7, %v2526_v35, %v938_v43 }
  0x58   : > { %v940_v48 = vrot.slane %v938_v43, 4  ;;  %2811 = vmatprep.subr.bf16.mxu1 %v3722_v31  ;;  %v541_v60 = vrot.slane %v540_v46, 4  ;;  %2902 = vmatpush3.bf16.msra.mxu0 %v3179_v54  ;;  %v952_v9 = vrot.slane %v3619_v39, 5  ;;  %v2528_v1 = vrot.slane %v3616_v38, 9 }
  0x59   : > { %v946_v61 = vsel %vm3588_vm7, %v2527_v47, %v945_v50  ;;  %v947_v62 = vrot.slane %v945_v50, 4  ;;  %v536_v26 = vsel %vm3504_vm4, %v531_v51, %v535_v5  ;;  %v955_v2 = vrot.slane %v3656_v0, 5  ;;  %3106 = vmatprep.subr.msk.bf16.mxu0 %vm617_vm0, %v3182_v23  ;;  %v3796_v50 = vld [vmem:[%s3461_s7 + $0x68] sm:$0x1] }
  0x5a   : > { %v942_v42 = vsel %vm3588_vm7, %v940_v48, %v941_v44  ;;  %v546_v54 = vsel %vm3504_vm4, %v541_v60, %v545_v34  ;;  %v2503_v18 = vcombine.low %v3470_v13, %v3473_v14  ;;  %v954_v7 = vrot.slane %v952_v9, 4  ;;  %v3773_v34 = vld [vmem:[%s4128_s2 + $0x8c] sm:$0xff]  }
  0x5b   : > { %v3759_v17 = vcombine.low %v939_v58, %v942_v42  ;;  %v949_v19 = vsel %vm3588_vm7, %v947_v62, %v948_v28  ;;  %v3765_v29 = vcombine.low %v536_v26, %v546_v54  ;;  %v1642_v0 = vsel %vm617_vm0, %v3182_v23, 0  ;;  %v3789_v23 = vld [vmem:[%s3461_s7 + $0x60] sm:$0xf]  ;;  %v3830_v54 = vld [vmem:[%s3461_s7 + $0x70] sm:$0xf] }
  0x5c   : > { %v3767_v5 = vcombine.low %v946_v61, %v949_v19  ;;  %v2529_v35 = vrot.slane %v3675_v27, 9  ;;  %v959_v3 = vrot.slane %v3684_v49, 5  ;;  %v962_v43 = vrot.slane %v3688_v12, 5  ;;  %2904 = vmatpush3.bf16.msra.mxu0 %v1642_v0 }
  0x5d   : > { %2888 = vmatmul.mubr.msk.bf16.gmra.mrb[4].mxu0 %vm592_vm3, %v3759_v17  ;;  %2786 = vmatmul.mubr.msk.bf16.gmra.mrb[12].mxu1 %vm592_vm3, %v3765_v29  ;;  %v953_v44 = vsel %vm3588_vm7, %v2528_v1, %v952_v9  ;;  %v956_v45 = vsel %vm3588_vm7, %v954_v7, %v955_v2  ;;  %v1464_v46 = vrot.slane %v3748_v40, 5  ;;  %v913_v28 = vrot.slane %v3476_v15, 5  ;;  %v346_v7 = vld [vmem:[%s3461_s7 + $0x74] sm:$0x1] }
  0x5e   : > { %2891 = vmatprep.mubr.msk.bf16.mxu0 %vm592_vm3, %v3767_v5  ;;  %2795 = vmatprep.mubr.msk.bf16.mxu1 %vm592_vm3, %v2503_v18  ;;  %v960_v12 = vsel %vm3588_vm7, %v2529_v35, %v959_v3  ;;  %v961_v47 = vrot.slane %v959_v3, 4  ;;  %v3801_v51 = vcombine.low %v3483_v20, %v3488_v22  ;;  %v3804_v58 = vcombine.low %v953_v44, %v956_v45  ;;  %v3815_v22 = vld [vmem:[%s3461_s7 + $0x6c] sm:$0xf]  ;;  %v3193_v3 = vld [vmem:[%s4128_s2 + $0x38] ss:$0 sps:$4 sm:$0x33]  }
  0x5f   : > { %2921 = vmatprep.subr.bf16.mxu0 %v3773_v34  ;;  %v2588_v60 = vrot.slane %v3789_v23, 9  ;;  %v2522_v61 = vrot.slane %v3470_v13, 9  ;;  %v1466_v9 = vrot.slane %v1464_v46, 4  ;;  %v1467_v15 = vrot.slane %v3796_v50, 5  ;;  %v3191_v13 = vld [vmem:[%s4128_s2 + $0x30] sm:$0xff]  }
  0x60   : > { %v963_v48 = vsel %vm3588_vm7, %v961_v47, %v962_v43  ;;  %v910_v20 = vrot.slane %v3473_v14, 5  ;;  %v3819_v26 = vcombine.low %v3500_v36, %v3509_v41  ;;  %v1758_v42 = vshrl.u32 %v3815_v22, 16 }
  0x61   : > { %v3810_v62 = vcombine.low %v960_v12, %v963_v48  ;;  %v1761_v14 = vshll.u32 %v3815_v22, 16  ;;  %v1771_v36 = vshrl.u32 %v3830_v54, 16  ;;  %v1465_v41 = vsel %vm3588_vm7, %v2588_v60, %v1464_v46 }
  0x62   : > { %v3827_v1 = vsel %vm3588_vm7, %v2522_v61, %v910_v20  ;;  %v912_v2 = vrot.slane %v910_v20, 4  ;;  %v1468_v18 = vsel %vm3588_vm7, %v1466_v9, %v1467_v15  ;;  %v1760_v35 = vrot.slane %v1758_v42, 4 }
  0x63   : > { %v1763_v43 = vrot.slane %v1761_v14, 5  ;;  %v3854_v44 = vcombine.low %v1465_v41, %v1468_v18  ;;  %v1767_v45 = vshll.u32 %v3830_v54, 16  ;;  %v1773_v46 = vrot.slane %v1771_v36, 4 }
  0x64   : > { %v914_v19 = vsel %vm3588_vm7, %v912_v2, %v913_v28  ;;  %v1777_v12 = vshll.u32 %v346_v7, 16  ;;  %v3859_v47 = vcombine.low %v3526_v56, %v3529_v57  ;;  %v2640_v28 = vrot.slane %v3815_v22, 9  ;;  %v3197_v56 = vld [vmem:[%s4128_s2 + $0x3c] sm:$0xff]  }
  0x65   : > { %2892 = vmatmul.mubr.msk.bf16.gmra.mrb[8].mxu0 %vm592_vm3, %v3804_v58  ;;  %2796 = vmatmul.mubr.msk.bf16.vlgmr.msra.gmra.mrb[0].mxu1 %vm592_vm3, %v3801_v51  ;;  %v2535_v0 = vcombine.low %v3827_v1, %v914_v19  ;;  %v1927_v48 = vrot.slane %v3830_v54, 5  ;;  %v3865_v60 = vcombine.low %v3542_v11, %v3548_v21  ;;  %v1769_v61 = vrot.slane %v1767_v45, 5  ;;  %v3192_v19 = vld [vmem:[%s4128_s2 + $0x94] sm:$0xff]  }
  0x66   : > { %2895 = vmatprep.mubr.msk.bf16.mxu0 %vm592_vm3, %v3810_v62  ;;  %2799 = vmatprep.mubr.msk.bf16.mxu1 %vm592_vm3, %v3819_v26  ;;  %v1930_v9 = vrot.slane %v346_v7, 5  ;;  %v1034_v15 = vsel %vm617_vm0, %v3193_v3, 0  ;;  %v1779_v21 = vrot.slane %v1777_v12, 5  ;;  %v3896_v41 = vcombine.low %v3582_v63, %v3601_v25  ;;  %v3194_v63 = vld [vmem:[%s4128_s2 + $0x9c] ss:$0 sps:$4 sm:$0x33]  }
  0x67   : > { %2812 = vmatpush3.bf16.msra.mxu1 %v3722_v31  ;;  %v1764_v31 = vor.u32 %v1763_v43, %v1760_v35  ;;  %v3874_v20 = vsel %vm3588_vm7, %v2640_v28, %v1927_v48  ;;  %v1929_v42 = vrot.slane %v1927_v48, 4  ;;  %v1774_v11 = vor.u32 %v1773_v46, %v1769_v61 }
  0x68   : > { %2813 = vmatprep.subr.bf16.mxu1 %v3191_v13  ;;  %v3902_v16 = vcombine.low %v3616_v38, %v3619_v39  ;;  %v3921_v25 = vcombine.low %v3675_v27, %v3684_v49  ;;  %v1809_v38 = vsel %vm617_vm0, %v3194_v63, 0  ;;  %v3198_v39 = vld [vmem:[%s4128_s2 + $0xa0] sm:$0xff]   ;;  %v3937_v27 = vcombine.low %v3789_v23, %v3748_v40 }
  0x69   : > { %v1765_v57 = vrot.slane %v1764_v31, 4  ;;  %v3886_v1 = vsel %vm3588_vm7, %v1929_v42, %v1930_v9  ;;  %v1775_v2 = vrot.slane %v1774_v11, 4  ;;  %v3199_v49 = vld [vmem:[%s4128_s2 + $0x44] sm:$0xff]   ;;  %v2611_v7 = vcombine.low %v3815_v22, %v3830_v54 }
  0x6a   : > { %v2646_v14 = vcombine.low %v3874_v20, %v3886_v1  ;;  %v1298_v22 = vshll.u32 %v3789_v23, 16  ;;  %v1304_v54 = vshll.u32 %v3748_v40, 16  ;;  %v1308_v35 = vshrl.u32 %v3748_v40, 16  ;;  %v3202_v40 = vld [vmem:[%s4128_s2 + $0xb0] ss:$0 sps:$4 sm:$0x33]  }
  0x6b   : > { %2814 = vmatpush3.bf16.msra.mxu1 %v3191_v13  ;;  %v1770_v13 = vsel %vm3504_vm4, %v1765_v57, %v1769_v61  ;;  %v1780_v36 = vsel %vm3504_vm4, %v1775_v2, %v1779_v21  ;;  %v1314_v31 = vshll.u32 %v3796_v50, 16  ;;  %v1960_v61 = vsel %vm617_vm0, %v3202_v40, 0 }
  0x6c   : > { %3101 = vmatprep.subr.msk.bf16.mxu1 %vm617_vm0, %v3193_v3  ;;  %v3898_v18 = vcombine.low %v1770_v13, %v1780_v36  ;;  %v1300_v43 = vrot.slane %v1298_v22, 5  ;;  %v1306_v45 = vrot.slane %v1304_v54, 5  ;;  %v1310_v46 = vrot.slane %v1308_v35, 4 }
  0x6d   : > { %2896 = vmatmul.mubr.msk.bf16.gmra.mrb[12].mxu0 %vm592_vm3, %v3854_v44  ;;  %2800 = vmatmul.mubr.msk.bf16.gmra.mrb[4].mxu1 %vm592_vm3, %v3859_v47  ;;  %v1316_v48 = vrot.slane %v1314_v31, 5 }
  0x6e   : > { %2905 = vmatprep.mubr.msk.bf16.mxu0 %vm592_vm3, %v3819_v26  ;;  %2803 = vmatprep.mubr.msk.bf16.mxu1 %vm592_vm3, %v3865_v60  ;;  %v1311_v12 = vor.u32 %v1310_v46, %v1306_v45 }
  0x6f   : > { %2816 = vmatpush3.bf16.msra.mxu1 %v1034_v15 }
  0x70   : > { %2833 = vmatprep.subr.bf16.mxu1 %v3197_v56  ;;  %v1312_v28 = vrot.slane %v1311_v12, 4 }
  0x72   : > { %v1317_v50 = vsel %vm3504_vm4, %v1312_v28, %v1316_v48 }
  0x75   : > { %2906 = vmatmul.mubr.msk.bf16.vlgmr.msra.gmra.mrb[0].mxu0 %vm592_vm3, %v3859_v47  ;;  %2804 = vmatmul.mubr.msk.bf16.gmra.mrb[8].mxu1 %vm592_vm3, %v3896_v41 }
  0x76   : > { %2922 = vmatpush3.bf16.msra.mxu0 %v3773_v34  ;;  %2807 = vmatprep.mubr.msk.bf16.mxu1 %vm592_vm3, %v3902_v16  ;;  %v3201_v34 = vld [vmem:[%s4128_s2 + $0x4c] ss:$0 sps:$4 sm:$0x33]  }
  0x77   : > { %2909 = vmatprep.mubr.msk.bf16.mxu0 %vm592_vm3, %v3865_v60  ;;  %2923 = vmatprep.subr.bf16.mxu0 %v3192_v19 }
  0x7a   : > { %2924 = vmatpush3.bf16.msra.mxu0 %v3192_v19 }
  0x7b   : > { %3107 = vmatprep.subr.msk.bf16.mxu0 %vm617_vm0, %v3194_v63 }
  0x7d   : > { %2910 = vmatmul.mubr.msk.bf16.gmra.mrb[4].mxu0 %vm592_vm3, %v3896_v41  ;;  %2808 = vmatmul.mubr.msk.bf16.gmra.mrb[12].mxu1 %vm592_vm3, %v3921_v25 }
  0x7e   : > { %2913 = vmatprep.mubr.msk.bf16.mxu0 %vm592_vm3, %v3902_v16  ;;  %2817 = vmatprep.mubr.msk.bf16.mxu1 %vm592_vm3, %v2535_v0  ;;  %v1295_v0 = vshrl.u32 %v3789_v23, 16 }
  0x7f   : > { %2926 = vmatpush3.bf16.msra.mxu0 %v1809_v38 }
  0x80   : > { %2943 = vmatprep.subr.bf16.mxu0 %v3198_v39  ;;  %v1297_v3 = vrot.slane %v1295_v0, 4 }
  0x82   : > { %v1301_v23 = vor.u32 %v1300_v43, %v1297_v3 }
  0x85   : > { %2914 = vmatmul.mubr.msk.bf16.gmra.mrb[8].mxu0 %vm592_vm3, %v3921_v25  ;;  %2818 = vmatmul.mubr.msk.bf16.vlgmr.msra.gmra.mrb[0].mxu1 %vm592_vm3, %v3638_v53  ;;  %v1179_v53 = vsel %vm617_vm0, %v3201_v34, 0 }
  0x86   : > { %2917 = vmatprep.mubr.msk.bf16.mxu0 %vm592_vm3, %v3937_v27  ;;  %2821 = vmatprep.mubr.msk.bf16.mxu1 %vm592_vm3, %v3681_v30 }
  0x87   : > { %2834 = vmatpush3.bf16.msra.mxu1 %v3197_v56 }
  0x88   : > { %2835 = vmatprep.subr.bf16.mxu1 %v3199_v49 }
  0x8b   : > { %2836 = vmatpush3.bf16.msra.mxu1 %v3199_v49 }
  0x8c   : > { %3102 = vmatprep.subr.msk.bf16.mxu1 %vm617_vm0, %v3201_v34 }
  0x8d   : > { %2918 = vmatmul.mubr.msk.bf16.gmra.mrb[12].mxu0 %vm592_vm3, %v2611_v7  ;;  %2822 = vmatmul.mubr.msk.bf16.gmra.mrb[4].mxu1 %vm592_vm3, %v3717_v24 }
  0x8e   : > { %2927 = vmatprep.mubr.msk.bf16.mxu0 %vm592_vm3, %v3576_v59  ;;  %2825 = vmatprep.mubr.msk.bf16.mxu1 %vm592_vm3, %v3759_v17  ;;  %v3200_v59 = vld [vmem:[%s4128_s2 + $0xa8] sm:$0xff]  }
  0x8f   : > { %2838 = vmatpush3.bf16.msra.mxu1 %v1179_v53 }
  0x90   : > { %2965 = vmatprep.subr.bf16.mxu1 %v3423_v4 }
  0x95   : > { %2928 = vmatmul.mubr.msk.bf16.vlgmr.msra.gmra.mrb[0].mxu0 %vm592_vm3, %v3611_v32  ;;  %2826 = vmatmul.mubr.msk.bf16.gmra.mrb[8].mxu1 %vm592_vm3, %v3767_v5  ;;  %v1302_v32 = vrot.slane %v1301_v23, 4 }
  0x96   : > { %2944 = vmatpush3.bf16.msra.mxu0 %v3198_v39  ;;  %2829 = vmatprep.mubr.msk.bf16.mxu1 %vm592_vm3, %v3804_v58 }
  0x97   : > { %2931 = vmatprep.mubr.msk.bf16.mxu0 %vm592_vm3, %v3636_v52  ;;  %2945 = vmatprep.subr.bf16.mxu0 %v3200_v59  ;;  %v1307_v52 = vsel %vm3504_vm4, %v1302_v32, %v1306_v45 }
  0x98   : > { %v2576_v9 = vcombine.low %v1307_v52, %v1317_v50 }
  0x9a   : > { %2946 = vmatpush3.bf16.msra.mxu0 %v3200_v59 }
  0x9b   : > { %3108 = vmatprep.subr.msk.bf16.mxu0 %vm617_vm0, %v3202_v40 }
  0x9d   : > { %2932 = vmatmul.mubr.msk.bf16.gmra.mrb[4].mxu0 %vm592_vm3, %v3699_v55  ;;  %2830 = vmatmul.mubr.msk.bf16.gmra.mrb[12].mxu1 %vm592_vm3, %v3810_v62 }
  0x9e   : > { %2935 = vmatprep.mubr.msk.bf16.mxu0 %vm592_vm3, %v3724_v33  ;;  %2839 = vmatprep.mubr.msk.bf16.mxu1 %vm592_vm3, %v3801_v51 }
  0x9f   : > { %2948 = vmatpush3.bf16.msra.mxu0 %v1960_v61 }
  0xa5   : > { %2936 = vmatmul.mubr.msk.bf16.gmra.mrb[8].mxu0 %vm592_vm3, %v3765_v29  ;;  %2840 = vmatmul.mubr.msk.bf16.vlgmr.msra.gmra.mrb[0].mxu1 %vm592_vm3, %v3819_v26 }
  0xa6   : > { %2939 = vmatprep.mubr.msk.bf16.mxu0 %vm592_vm3, %v2576_v9  ;;  %2843 = vmatprep.mubr.msk.bf16.mxu1 %vm592_vm3, %v3859_v47 }
  0xa7   : > { %2968 = vmatpush3.bf16.msra.mxu1 %v3423_v4 }
  0xa8   : > { %2966 = vmatprep.subr.bf16.mxu1 %v3433_v6 }
  0xab   : > { %2969 = vmatpush3.bf16.msra.mxu1 %v3433_v6 }
  0xac   : > { %3104 = vmatprep.subr.msk.bf16.mxu1 %vm617_vm0, %v3444_v8 }
  0xad   : > { %2940 = vmatmul.mubr.msk.bf16.gmra.mrb[12].mxu0 %vm592_vm3, %v3898_v18  ;;  %2844 = vmatmul.mubr.msk.bf16.gmra.mrb[4].mxu1 %vm592_vm3, %v3865_v60 }
  0xae   : > { %2949 = vmatprep.mubr.msk.bf16.mxu0 %vm592_vm3, %v3681_v30  ;;  %2847 = vmatprep.mubr.msk.bf16.mxu1 %vm592_vm3, %v3896_v41 }
  0xaf   : > { %2970 = vmatpush3.bf16.msra.mxu1 %v3452_v10 }
  0xb5   : > { %2950 = vmatmul.mubr.msk.bf16.vlgmr.msra.gmra.mrb[0].mxu0 %vm592_vm3, %v3717_v24  ;;  %2848 = vmatmul.mubr.msk.bf16.gmra.mrb[8].mxu1 %vm592_vm3, %v3902_v16 }
  0xb6   : > { %2953 = vmatprep.mubr.msk.bf16.mxu0 %vm592_vm3, %v3759_v17  ;;  %2851 = vmatprep.mubr.msk.bf16.mxu1 %vm592_vm3, %v3921_v25 }
  0xbd   : > { %2954 = vmatmul.mubr.msk.bf16.gmra.mrb[4].mxu0 %vm592_vm3, %v3767_v5  ;;  %2852 = vmatmul.mubr.msk.bf16.gmra.mrb[12].mxu1 %vm592_vm3, %v3937_v27 }
  0xbe   : > { %2957 = vmatprep.mubr.msk.bf16.mxu0 %vm592_vm3, %v3804_v58  ;;  %2869 = vmatprep.mubr.msk.bf16.mxu1 %vm592_vm3, %v3699_v55 }
  0xc5   : > { %2958 = vmatmul.mubr.msk.bf16.gmra.mrb[8].mxu0 %vm592_vm3, %v3810_v62  ;;  %2870 = vmatmul.mubr.msk.bf16.vlgmr.msra.gmra.mrb[8].mxu1 %vm592_vm3, %v3724_v33 }
  0xc6   : > { %2961 = vmatprep.mubr.msk.bf16.mxu0 %vm592_vm3, %v3854_v44  ;;  %2873 = vmatprep.mubr.msk.bf16.mxu1 %vm592_vm3, %v3765_v29  ;;  %v4051_v29 = vld [vmem:[%s4129_s3] ss:$0 sm:$0xff] }
  0xcd   : > { %2962 = vmatmul.mubr.msk.bf16.gmra.mrb[12].mxu0 %vm592_vm3, %v2646_v14  ;;  %2874 = vmatmul.mubr.msk.bf16.gmra.mrb[12].mxu1 %vm592_vm3, %v2576_v9 }
 0x178   : > { %v2841_v4 = vpop.f32.mrb[0].mxu1 }
 0x179   : > { %v1215_v6 = vpop.f32.mrb[1].mxu1 }
 0x17a   : > { %v2842_v8 = vpop.f32.mrb[2].mxu1 }
 0x17b   : > { %v1218_v10 = vpop.f32.mrb[3].mxu1 }
 0x180   : > { %v2845_v37 = vpop.f32.mrb[4].mxu1 }
 0x181   : > { %v1231_v30 = vpop.f32.mrb[5].mxu1 }
 0x182   : > { %v2846_v55 = vpop.f32.mrb[6].mxu1 }
 0x183   : > { %v1234_v24 = vpop.f32.mrb[7].mxu1 }
 0x188   : > { %v2951_v33 = vpop.f32.mrb[0].mxu0 }
 0x189   : > { %v2971_v17 = vadd.f32 %v2951_v33, %v2841_v4  ;;  %v1996_v5 = vpop.f32.mrb[1].mxu0 }
 0x18a   : > { %v2972_v51 = vadd.f32 %v1996_v5, %v1215_v6  ;;  %v2952_v58 = vpop.f32.mrb[2].mxu0 }
 0x18b   : > { %v2973_v62 = vadd.f32 %v2952_v58, %v2842_v8  ;;  %v1999_v26 = vpop.f32.mrb[3].mxu0  ;;  %v2084_v1 = vadd.f32 %v2971_v17, %v4051_v29 }
 0x18c   : > { %v2974_v44 = vadd.f32 %v1999_v26, %v1218_v10  ;;  %v2082_v47 = vadd.f32 %v2972_v51, %v4051_v29 }
 0x18d   : > { %v2085_v14 = vadd.f32 %v2973_v62, %v4051_v29 }
 0x18e   : > { %2098 = vxpose.xlu0.b32.start [1/16] %v2082_v47, 128  ;;  %v2083_v15 = vadd.f32 %v2974_v44, %v4051_v29 }
 0x190   : > { %v2955_v60 = vpop.f32.mrb[4].mxu0 }
 0x191   : > { %v2975_v56 = vadd.f32 %v2955_v60, %v2845_v37  ;;  %v2012_v57 = vpop.f32.mrb[5].mxu0 }
 0x192   : > { %v2976_v20 = vadd.f32 %v2012_v57, %v1231_v30  ;;  %v2956_v42 = vpop.f32.mrb[6].mxu0  ;;  %2099 = vxpose.xlu0.b32.cont [2/16] %v2083_v15, 128 }
 0x193   : > { %v2977_v11 = vadd.f32 %v2956_v42, %v2846_v55  ;;  %v2015_v21 = vpop.f32.mrb[7].mxu0  ;;  %v2088_v23 = vadd.f32 %v2975_v56, %v4051_v29 }
 0x194   : > { %v2978_v13 = vadd.f32 %v2015_v21, %v1234_v24  ;;  %v2086_v49 = vadd.f32 %v2976_v20, %v4051_v29 }
 0x195   : > { %v2089_v31 = vadd.f32 %v2977_v11, %v4051_v29 }
 0x196   : > { %2100 = vxpose.xlu0.b32.cont [3/16] %v2084_v1, 128  ;;  %v2087_v53 = vadd.f32 %v2978_v13, %v4051_v29 }
 0x198   : > { %v2959_v2 = vpop.f32.mrb[8].mxu0  ;;  %v2871_v36 = vpop.f32.mrb[8].mxu1 }
 0x199   : > { %v2028_v41 = vpop.f32.mrb[9].mxu0  ;;  %v2979_v18 = vadd.f32 %v2959_v2, %v2871_v36  ;;  %v1414_v16 = vpop.f32.mrb[9].mxu1 }
 0x19a   : > { %v2960_v19 = vpop.f32.mrb[10].mxu0  ;;  %2101 = vxpose.xlu0.b32.cont [4/16] %v2085_v14, 128  ;;  %v2980_v63 = vadd.f32 %v2028_v41, %v1414_v16  ;;  %v2872_v25 = vpop.f32.mrb[10].mxu1 }
 0x19b   : > { %v2031_v38 = vpop.f32.mrb[11].mxu0  ;;  %v2981_v39 = vadd.f32 %v2960_v19, %v2872_v25  ;;  %v1417_v27 = vpop.f32.mrb[11].mxu1  ;;  %v2092_v48 = vadd.f32 %v2979_v18, %v4051_v29 }
 0x19c   : > { %v2982_v34 = vadd.f32 %v2031_v38, %v1417_v27  ;;  %v2090_v32 = vadd.f32 %v2980_v63, %v4051_v29 }
 0x19d   : > { %v2093_v61 = vadd.f32 %v2981_v39, %v4051_v29 }
 0x19e   : > { %2102 = vxpose.xlu0.b32.cont [5/16] %v2086_v49, 128  ;;  %v2091_v28 = vadd.f32 %v2982_v34, %v4051_v29 }
 0x1a0   : > { %v2963_v7 = vpop.f32.mrb[12].mxu0  ;;  %v2875_v0 = vpop.f32.mrb[12].mxu1 }
 0x1a1   : > { %v2044_v22 = vpop.f32.mrb[13].mxu0  ;;  %v2983_v54 = vadd.f32 %v2963_v7, %v2875_v0  ;;  %v1430_v35 = vpop.f32.mrb[13].mxu1 }
 0x1a2   : > { %v2964_v3 = vpop.f32.mrb[14].mxu0  ;;  %2103 = vxpose.xlu0.b32.cont [6/16] %v2087_v53, 128  ;;  %v2984_v43 = vadd.f32 %v2044_v22, %v1430_v35  ;;  %v2876_v45 = vpop.f32.mrb[14].mxu1 }
 0x1a3   : > { %v2047_v46 = vpop.f32.mrb[15].mxu0  ;;  %v2985_v59 = vadd.f32 %v2964_v3, %v2876_v45  ;;  %v1433_v40 = vpop.f32.mrb[15].mxu1  ;;  %v2096_v9 = vadd.f32 %v2983_v54, %v4051_v29 }
 0x1a4   : > { %v2986_v12 = vadd.f32 %v2047_v46, %v1433_v40  ;;  %v2094_v52 = vadd.f32 %v2984_v43, %v4051_v29 }
 0x1a5   : > { %v2097_v4 = vadd.f32 %v2985_v59, %v4051_v29 }
 0x1a6   : > { %2104 = vxpose.xlu0.b32.cont [7/16] %v2088_v23, 128  ;;  %v2095_v50 = vadd.f32 %v2986_v12, %v4051_v29 }
 0x1aa   : > { %2105 = vxpose.xlu0.b32.cont [8/16] %v2089_v31, 128 }
 0x1ae   : > { %2106 = vxpose.xlu0.b32.cont [9/16] %v2090_v32, 128 }
 0x1b2   : > { %2107 = vxpose.xlu0.b32.cont [10/16] %v2091_v28, 128 }
 0x1b6   : > { %2108 = vxpose.xlu0.b32.cont [11/16] %v2092_v48, 128 }
 0x1ba   : > { %2109 = vxpose.xlu0.b32.cont [12/16] %v2093_v61, 128  ;;  %v2206_v61 = vld [vmem:[%s4073_s18] sm:$0xff] }
 0x1be   : > { %2110 = vxpose.xlu0.b32.cont [13/16] %v2094_v52, 128 }
 0x1c2   : > { %2111 = vxpose.xlu0.b32.cont [14/16] %v2095_v50, 128 }
 0x1c6   : > { %2112 = vxpose.xlu0.b32.cont [15/16] %v2096_v9, 128 }
 0x1ca   : > { %2113 = vxpose.xlu0.b32.end [16/16] %v2097_v4, 128 }
 0x20e   : > { %v2114_v6 = vpop.trf.xlu0 }
 0x20f   : > { %v2130_v24 = vsub.f32 0.0, %v2114_v6  ;;  %v2207_v6 = vld [vmem:[%s4073_s18 + $0x8] sm:$0xff] }
 0x211   : > { %v2142_v51 = vmul.f32 1.442695, %v2130_v24 }
 0x212   : > { %v2115_v8 = vpop.trf.xlu0 }
 0x213   : > { %v2131_v62 = vsub.f32 0.0, %v2115_v8  ;;  %3203 = vpow2.f32 %v2142_v51 }
 0x215   : > { %v2144_v29 = vmul.f32 1.442695, %v2131_v62 }
 0x216   : > { %v2116_v10 = vpop.trf.xlu0 }
 0x217   : > { %v2132_v60 = vsub.f32 0.0, %v2116_v10 }
 0x219   : > { %v2146_v20 = vmul.f32 1.442695, %v2132_v60 }
 0x21a   : > { %v2117_v37 = vpop.trf.xlu0 }
 0x21b   : > { %v2133_v42 = vsub.f32 0.0, %v2117_v37 }
 0x21d   : > { %v3204_v13 = vpop.eup %3203  ;;  %v2148_v1 = vmul.f32 1.442695, %v2133_v42 }
 0x21e   : > { %v2118_v30 = vpop.trf.xlu0  ;;  %v2166_v18 = vadd.f32 1.0, %v3204_v13 }
 0x21f   : > { %v2134_v33 = vsub.f32 0.0, %v2118_v30 }
 0x221   : > { %v2150_v58 = vmul.f32 1.442695, %v2134_v33 }
 0x222   : > { %v2119_v55 = vpop.trf.xlu0 }
 0x223   : > { %v2135_v17 = vsub.f32 0.0, %v2119_v55  ;;  %3205 = vpow2.f32 %v2150_v58  ;;  %v2208_v58 = vld [vmem:[%s4073_s18 + $0x10] sm:$0xff] }
 0x225   : > { %v2152_v26 = vmul.f32 1.442695, %v2135_v17 }
 0x226   : > { %v2120_v5 = vpop.trf.xlu0 }
 0x227   : > { %v2136_v47 = vsub.f32 0.0, %v2120_v5  ;;  %3207 = vpow2.f32 %v2152_v26 }
 0x228   : > { %3209 = vpow2.f32 %v2144_v29 }
 0x229   : > { %v2154_v56 = vmul.f32 1.442695, %v2136_v47 }
 0x22a   : > { %v2121_v44 = vpop.trf.xlu0 }
 0x22b   : > { %v2137_v57 = vsub.f32 0.0, %v2121_v44  ;;  %3211 = vpow2.f32 %v2154_v56 }
 0x22c   : > { %3213 = vpow2.f32 %v2146_v20 }
 0x22d   : > { %v2156_v21 = vmul.f32 1.442695, %v2137_v57  ;;  %v3206_v2 = vpop.eup %3205  ;;  %v2209_v57 = vld [vmem:[%s4073_s18 + $0x18] sm:$0xff] }
 0x22e   : > { %v2122_v15 = vpop.trf.xlu0  ;;  %v2170_v19 = vadd.f32 1.0, %v3206_v2 }
 0x22f   : > { %v2138_v14 = vsub.f32 0.0, %v2122_v15  ;;  %3215 = vpow2.f32 %v2156_v21 }
 0x230   : > { %3217 = vpow2.f32 %v2148_v1 }
 0x231   : > { %v3208_v41 = vpop.eup %3207  ;;  %v2158_v63 = vmul.f32 1.442695, %v2138_v14  ;;  %3219 = vrcp.f32 %v2166_v18 }
 0x232   : > { %v2123_v11 = vpop.trf.xlu0  ;;  %v3210_v38 = vpop.eup %3209  ;;  %v2171_v39 = vadd.f32 1.0, %v3208_v41  ;;  %3221 = vrcp.f32 %v2170_v19 }
 0x233   : > { %v2139_v16 = vsub.f32 0.0, %v2123_v11  ;;  %v2167_v7 = vadd.f32 1.0, %v3210_v38  ;;  %3223 = vpow2.f32 %v2158_v63 }
 0x234   : > { %3225 = vrcp.f32 %v2171_v39 }
 0x235   : > { %v2160_v27 = vmul.f32 1.442695, %v2139_v16  ;;  %v3212_v34 = vpop.eup %3211 }
 0x236   : > { %v2124_v36 = vpop.trf.xlu0  ;;  %v3214_v0 = vpop.eup %3213  ;;  %v2172_v35 = vadd.f32 1.0, %v3212_v34 }
 0x237   : > { %v2140_v49 = vsub.f32 0.0, %v2124_v36  ;;  %3227 = vpow2.f32 %v2160_v27  ;;  %v2168_v43 = vadd.f32 1.0, %v3214_v0 }
 0x239   : > { %v2162_v22 = vmul.f32 1.442695, %v2140_v49  ;;  %v3216_v3 = vpop.eup %3215 }
 0x23a   : > { %v2125_v25 = vpop.trf.xlu0  ;;  %v3218_v46 = vpop.eup %3217  ;;  %v2173_v40 = vadd.f32 1.0, %v3216_v3 }
 0x23b   : > { %v2141_v54 = vsub.f32 0.0, %v2125_v25  ;;  %v3220_v23 = vpop.eup %3219  ;;  %v2169_v12 = vadd.f32 1.0, %v3218_v46 }
 0x23c   : > { %v3222_v32 = vpop.eup %3221 }
 0x23d   : > { %v2164_v59 = vmul.f32 1.442695, %v2141_v54  ;;  %v3224_v28 = vpop.eup %3223  ;;  %v2210_v10 = vmul.f32 %v3222_v32, %v2206_v61 }
 0x23e   : > { %v2126_v53 = vpop.trf.xlu0  ;;  %v3226_v48 = vpop.eup %3225  ;;  %v2174_v4 = vadd.f32 1.0, %v3224_v28 }
 0x23f   : > { %3229 = vtanh.f32 %v2126_v53  ;;  %v2211_v17 = vmul.f32 %v3226_v48, %v2207_v6 }
 0x240   : > { %3231 = vrcp.f32 %v2167_v7 }
 0x241   : > { %v3228_v52 = vpop.eup %3227 }
 0x242   : > { %v2127_v45 = vpop.trf.xlu0  ;;  %v2175_v55 = vadd.f32 1.0, %v3228_v52 }
 0x243   : > { %3233 = vtanh.f32 %v2127_v45 }
 0x244   : > { %3235 = vpow2.f32 %v2162_v22 }
 0x245   : > { %3237 = vrcp.f32 %v2172_v35 }
 0x246   : > { %3239 = vrcp.f32 %v2168_v43  ;;  %v2128_v31 = vpop.trf.xlu0 }
 0x247   : > { %3241 = vtanh.f32 %v2128_v31 }
 0x248   : > { %3243 = vpow2.f32 %v2164_v59 }
 0x249   : > { %3245 = vrcp.f32 %v2173_v40  ;;  %v3230_v9 = vpop.eup %3229 }
 0x24a   : > { %3247 = vrcp.f32 %v2169_v12  ;;  %v2129_v50 = vpop.trf.xlu0  ;;  %v3232_v8 = vpop.eup %3231  ;;  %v2214_v37 = vmul.f32 %v3230_v9, %v3220_v23 }
 0x24b   : > { %3249 = vtanh.f32 %v2129_v50 }
 0x24c   : > { %v2218_v33 = vadd.f32 %v2214_v37, %v2210_v10  ;;  %3251 = vrcp.f32 %v2174_v4 }
 0x24d   : > { %v3234_v30 = vpop.eup %3233 }
 0x24e   : > { %v3236_v24 = vpop.eup %3235  ;;  %v2215_v5 = vmul.f32 %v3234_v30, %v3232_v8  ;;  %3253 = vtanh.f32 %v2218_v33  ;;  %2230 = vst [vmem:[%s4079_s14] sm:$0xff] %v2218_v33 }
 0x24f   : > { %v3238_v51 = vpop.eup %3237  ;;  %3255 = vrcp.f32 %v2175_v55  ;;  %v2176_v47 = vadd.f32 1.0, %v3236_v24 }
 0x250   : > { %v3240_v62 = vpop.eup %3239  ;;  %v2219_v26 = vadd.f32 %v2215_v5, %v2211_v17  ;;  %v2212_v60 = vmul.f32 %v3238_v51, %v2208_v58 }
 0x251   : > { %v3242_v44 = vpop.eup %3241 }
 0x252   : > { %v3244_v29 = vpop.eup %3243  ;;  %3257 = vtanh.f32 %v2219_v26  ;;  %2231 = vst [vmem:[%s4079_s14 + $0x8] sm:$0xff] %v2219_v26  ;;  %v2216_v15 = vmul.f32 %v3242_v44, %v3240_v62 }
 0x253   : > { %v3246_v56 = vpop.eup %3245  ;;  %3259 = vrcp.f32 %v2176_v47  ;;  %v2177_v21 = vadd.f32 1.0, %v3244_v29 }
 0x254   : > { %v3248_v20 = vpop.eup %3247  ;;  %v2220_v42 = vadd.f32 %v2216_v15, %v2212_v60  ;;  %v2213_v13 = vmul.f32 %v3246_v56, %v2209_v57 }
 0x255   : > { %v3250_v11 = vpop.eup %3249 }
 0x256   : > { %3261 = vtanh.f32 %v2220_v42  ;;  %2232 = vst [vmem:[%s4079_s14 + $0x10] sm:$0xff] %v2220_v42  ;;  %v2217_v1 = vmul.f32 %v3250_v11, %v3248_v20  ;;  %v3252_v14 = vpop.eup %3251 }
 0x257   : > { %3263 = vrcp.f32 %v2177_v21 }
 0x258   : > { %v2221_v2 = vadd.f32 %v2217_v1, %v2213_v13  ;;  %v3254_v36 = vpop.eup %3253 }
 0x259   : > { %v3256_v41 = vpop.eup %3255  ;;  %v2226_v18 = vmul.f32 %v3254_v36, %v3252_v14 }
 0x25a   : > { %3265 = vtanh.f32 %v2221_v2  ;;  %2233 = vst [vmem:[%s4079_s14 + $0x18] sm:$0xff] %v2221_v2 }
 0x25b   : > { %2234 = vst [vmem:[%s300_s15] sm:$0xff] %v2226_v18 }
 0x25c   : > { %v3258_v16 = vpop.eup %3257 }
 0x25d   : > { %v2227_v19 = vmul.f32 %v3258_v16, %v3256_v41  ;;  %v3260_v63 = vpop.eup %3259 }
 0x25f   : > { %2235 = vst [vmem:[%s300_s15 + $0x8] sm:$0xff] %v2227_v19 }
 0x260   : > { %v3262_v25 = vpop.eup %3261 }
 0x261   : > { %v2228_v38 = vmul.f32 %v3262_v25, %v3260_v63  ;;  %v3264_v39 = vpop.eup %3263  ;;  %2248 = sbr.rel (!%p3401_p6) target bundleno = 624 (0x270), region = 78 }
 0x262   : > { %v2286_v34 = vld [vmem:[%s300_s15] sm:$0xff] (%p3401_p6) }
 0x263   : > { %2236 = vst [vmem:[%s300_s15 + $0x10] sm:$0xff] %v2228_v38  ;;  %2287 = vst [vmem:[%s2252_s6] sm:$0xff] (%p3401_p6), %v2286_v34 }
 0x264   : > { %v3266_v27 = vpop.eup %3265 }
 0x265   : > { %v2229_v49 = vmul.f32 %v3266_v27, %v3264_v39 }
 0x266   : > { %v2288_v7 = vld [vmem:[%s300_s15 + $0x8] sm:$0xff] (%p3401_p6) }
 0x267   : > { %2237 = vst [vmem:[%s300_s15 + $0x18] sm:$0xff] %v2229_v49  ;;  %2289 = vst [vmem:[%s2252_s6 + $0x10] sm:$0xff] (%p3401_p6), %v2288_v7 }
 0x26a   : > { %v2290_v53 = vld [vmem:[%s300_s15 + $0x10] sm:$0xff] }
 0x26b   : > { %2291 = vst [vmem:[%s2252_s6 + $0x20] sm:$0xff] %v2290_v53 }
 0x26e   : > { %v2292_v0 = vld [vmem:[%s300_s15 + $0x18] sm:$0xff] }
 0x26f   : > { %2293 = vst [vmem:[%s2252_s6 + $0x30] sm:$0xff] %v2292_v0 }
 0x270 PF: > { %2299 = sbr.rel (!%p3401_p6) target bundleno = 631 (0x277), region = 116  ;;  %s2663_s7 = sshll.u32 (%p3401_p6), %s3309_s21, 3  ;;  %v2337_v22 = vld [vmem:[%s4079_s14] sm:$0xff] (%p3401_p6)  ;;  %v2339_v54 = vld [vmem:[%s4079_s14 + $0x8] sm:$0xff] (%p3401_p6)  ;;  %v2341_v35 = vld [vmem:[%s4079_s14 + $0x10] sm:$0xff] (%p3401_p6) }
 0x271   : > { %s2301_s9 = sadd.s32 (%p3401_p6), %s3305_s20, %s2663_s7  ;;  %v2343_v3 = vld [vmem:[%s4079_s14 + $0x18] sm:$0xff] (%p3401_p6) }
 0x272   : > { %s2664_s10 = sshll.u32 (%p3401_p6), %s2301_s9, 3 }
 0x273   : > { %s2303_s13 = scalar_lea.vmem (%p3401_p6), %s4131_s5, %s2664_s10 }
 0x274   : > { %2338 = vst [vmem:[%s2303_s13] sm:$0xff] (%p3401_p6), %v2337_v22  ;;  %2340 = vst [vmem:[%s2303_s13 + $0x10] sm:$0xff] (%p3401_p6), %v2339_v54 }
 0x275   : > { %2342 = vst [vmem:[%s2303_s13 + $0x20] sm:$0xff] (%p3401_p6), %v2341_v35  ;;  %2344 = vst [vmem:[%s2303_s13 + $0x30] sm:$0xff] (%p3401_p6), %v2343_v3 }
 0x277 PF: > { %s16_s24 = sadd.s32 1, %s3321_s24   ;;  %s4137_s18 = smov %s3301_s19 }
 0x278   : > { %p13_p13 = scmp.ge.s32.totalorder %s16_s24, 6   ;;  %s4138_s19 = smov %s3409_s8 }
 0x279   : > { %s4139_s20 = smov %s3313_s22  ;;  %s4140_s21 = smov %s3317_s23 }
 0x27a   : > { %s4141_s22 = smov %s4144_s25  ;;  %s4142_s23 = smov %s4148_s26 }
 0x27b   :  { %15 = sbr.rel (!%p13_p13) target bundleno = 4 (0x4), region = 209 }

</bundles_post_ra>
